<compile_context>
chip_gen: v7x
topology: tpu7x:2x2x1
jax: 0.10.0
libtpu: 0.0.40
codegen_flags: <defaults>
</compile_context>

<pallas_src>
import functools

import jax
import jax.numpy as jnp
import numpy as np
from jax.experimental import pallas as pl
from jax.experimental.pallas import tpu as pltpu


def _round_up(x, m):
    return ((x + m - 1) // m) * m


def _pad_gate_cols(w, h, hp):
    """Pad a (..., 4*h) gate-packed array to (..., 4*hp), per-gate, with zeros.

    PyTorch packs the 4 gates (i, f, g, o) contiguously along the last axis;
    padding each gate block to hp keeps every gate slice lane-aligned.
    """
    lead = w.shape[:-1]
    w4 = w.reshape(*lead, 4, h)
    w4 = jnp.pad(w4, [(0, 0)] * len(lead) + [(0, 0), (0, hp - h)])
    return w4.reshape(*lead, 4 * hp)


def _lstm_kernel(g_ref, whh_ref, hT_ref, h_ref, c_ref, *,
                 hidden_pad, chunk_size, seq_len, mask_tail):
    """One grid step == `chunk_size` timesteps of the recurrence.

    g_ref  : (Tc, Bp, 4*Hp)  pre-projected gate inputs (x @ W_ih^T + bias)
    whh_ref: (Hp, 4*Hp)      W_hh^T (gate-blocked, zero-padded)
    hT_ref : (Bp, Hp)        h at the last real timestep (written at last chunk)
    h_ref, c_ref: (Bp, Hp)   persistent VMEM state across grid steps
    """
    hp = hidden_pad
    chunk = pl.program_id(0)

    @pl.when(chunk == 0)
    def _init():
        h_ref[...] = jnp.zeros_like(h_ref)
        c_ref[...] = jnp.zeros_like(c_ref)

    whh = whh_ref[...]

    def step(j, carry):
        h_prev = h_ref[...]                     # (Bp, Hp) f32
        c_prev = c_ref[...]

        # Only the hidden matmul remains in the sequential loop.
        gates = g_ref[j] + jnp.dot(h_prev.astype(whh.dtype), whh,
                                   preferred_element_type=jnp.float32)

        # Lane-aligned gate slices (Hp is a multiple of 128).
        i_g = jax.nn.sigmoid(gates[:, 0 * hp:1 * hp])
        f_g = jax.nn.sigmoid(gates[:, 1 * hp:2 * hp])
        g_g = jnp.tanh(gates[:, 2 * hp:3 * hp])
        o_g = jax.nn.sigmoid(gates[:, 3 * hp:4 * hp])

        c_new = f_g * c_prev + i_g * g_g
        h_new = o_g * jnp.tanh(c_new)

        if mask_tail:
            # Time axis was padded to a multiple of chunk_size: freeze the
            # state on the padded tail steps.
            valid = (chunk * chunk_size + j) < seq_len
            c_ref[...] = jnp.where(valid, c_new, c_prev)
            h_ref[...] = jnp.where(valid, h_new, h_prev)
        else:
            c_ref[...] = c_new
            h_ref[...] = h_new
        return carry

    jax.lax.fori_loop(0, chunk_size, step, 0, unroll=True)

    @pl.when(chunk == pl.num_programs(0) - 1)
    def _finalize():
        hT_ref[...] = h_ref[...]


def lstm_forward(x, params, *, time_chunk=16, weights_dtype=jnp.float32):
    """x: (B, T, I) float32 (batch_first, like the PyTorch module)."""
    B, T, I = x.shape
    w_ih, w_hh, b_ih, b_hh, fc_w, fc_b = (
        params["w_ih"], params["w_hh"], params["b_ih"], params["b_hh"],
        params["fc_w"], params["fc_b"])
    H = w_hh.shape[1]

    Hp = _round_up(H, 128)          # lane-aligned hidden size
    Bp = _round_up(B, 8)            # sublane-aligned batch
    Tc = min(T, time_chunk)         # timesteps per grid step
    Tp = _round_up(T, Tc)
    num_chunks = Tp // Tc

    # --- Weight prep (gate-blocked, zero-padded) -----------------------------
    wih_p = _pad_gate_cols(jnp.transpose(w_ih), H, Hp)            # (I, 4Hp)
    bias_p = _pad_gate_cols((b_ih + b_hh)[None, :], H, Hp)[0]     # (4Hp,)
    whh_p = _pad_gate_cols(jnp.transpose(w_hh), H, Hp)            # (H, 4Hp)
    whh_p = jnp.pad(whh_p, ((0, Hp - H), (0, 0))).astype(weights_dtype)

    # --- Hoisted input projection: one big parallel matmul for all T ---------
    x_tm = jnp.transpose(x, (1, 0, 2))                            # (T, B, I)
    g = jnp.dot(x_tm.reshape(T * B, I), wih_p,
                preferred_element_type=jnp.float32) + bias_p
    g = g.reshape(T, B, 4 * Hp)
    g = jnp.pad(g, ((0, Tp - T), (0, Bp - B), (0, 0)))            # (Tp, Bp, 4Hp)

    kernel = functools.partial(_lstm_kernel, hidden_pad=Hp, chunk_size=Tc,
                               seq_len=T, mask_tail=(Tp != T))

    h_T = pl.pallas_call(
        kernel,
        out_shape=jax.ShapeDtypeStruct((Bp, Hp), jnp.float32),
        grid_spec=pltpu.PrefetchScalarGridSpec(
            num_scalar_prefetch=0,
            grid=(num_chunks,),
            in_specs=[
                # Pre-projected gate inputs, Tc timesteps per grid step.
                pl.BlockSpec((Tc, Bp, 4 * Hp), lambda i: (i, 0, 0)),
                # Loop-invariant W_hh^T (constant index_map -> fetched once).
                pl.BlockSpec((Hp, 4 * Hp), lambda i: (0, 0)),
            ],
            out_specs=pl.BlockSpec((Bp, Hp), lambda i: (0, 0)),
            scratch_shapes=[
                pltpu.VMEM((Bp, Hp), jnp.float32),   # h state
                pltpu.VMEM((Bp, Hp), jnp.float32),   # c state
            ],
        ),
        compiler_params=pltpu.CompilerParams(
            dimension_semantics=("arbitrary",),      # recurrence => sequential
        ),
    )(g, whh_p)

    # Final Linear on the last-timestep hidden state, outside the kernel.
    h_last = h_T[:B, :H]
    return h_last @ jnp.transpose(fc_w) + fc_b


def lstm_reference(x, params):
    """Pure-JAX reference matching torch.nn.LSTM + Linear semantics."""
    w_ih, w_hh = params["w_ih"], params["w_hh"]
    b_ih, b_hh = params["b_ih"], params["b_hh"]
    fc_w, fc_b = params["fc_w"], params["fc_b"]
    H = w_hh.shape[1]
    B = x.shape[0]

    def step(carry, x_t):
        h, c = carry
        gates = x_t @ w_ih.T + b_ih + h @ w_hh.T + b_hh
        i = jax.nn.sigmoid(gates[:, 0 * H:1 * H])
        f = jax.nn.sigmoid(gates[:, 1 * H:2 * H])
        g = jnp.tanh(gates[:, 2 * H:3 * H])
        o = jax.nn.sigmoid(gates[:, 3 * H:4 * H])
        c = f * c + i * g
        h = o * jnp.tanh(c)
        return (h, c), None

    h0 = jnp.zeros((B, H), jnp.float32)
    c0 = jnp.zeros((B, H), jnp.float32)
    (h_T, _), _ = jax.lax.scan(step, (h0, c0), jnp.transpose(x, (1, 0, 2)))
    return h_T @ fc_w.T + fc_b


def init_params(key, input_size, hidden_size, output_size):
    """Deterministic PyTorch-style uniform(-1/sqrt(H), 1/sqrt(H)) init."""
    ks = jax.random.split(key, 6)
    bound = 1.0 / np.sqrt(hidden_size)
    u = lambda k, shape: jax.random.uniform(k, shape, jnp.float32, -bound, bound)
    return {
        "w_ih": u(ks[0], (4 * hidden_size, input_size)),
        "w_hh": u(ks[1], (4 * hidden_size, hidden_size)),
        "b_ih": u(ks[2], (4 * hidden_size,)),
        "b_hh": u(ks[3], (4 * hidden_size,)),
        "fc_w": u(ks[4], (output_size, hidden_size)),
        "fc_b": u(ks[5], (output_size,)),
    }


if __name__ == "__main__":
    # Small shapes consistent with the module defaults:
    # input_size=1, hidden_size=50, output_size=1; batch=4, seq=8.
    B, T, I, H, O = 4, 8, 1, 50, 1

    key = jax.random.PRNGKey(0)
    k_x, k_p = jax.random.split(key)
    x = jax.random.normal(k_x, (B, T, I), dtype=jnp.float32)
    params = init_params(k_p, I, H, O)

    out = jax.block_until_ready(lstm_forward(x, params))
    ref = jax.block_until_ready(lstm_reference(x, params))

    np.testing.assert_allclose(np.asarray(out), np.asarray(ref),
                               rtol=1e-4, atol=1e-5)
    print("KERNEL_OK")
</pallas_src>

<mosaic_0001>
module attributes {stable_mosaic.version = 11 : i64} {
  func.func @_lstm_kernel(%arg0: i32, %arg1: memref<8x8x512xf32, #tpu.memory_space<vmem>>, %arg2: memref<128x512xf32, #tpu.memory_space<vmem>>, %arg3: memref<8x128xf32, #tpu.memory_space<vmem>>, %arg4: memref<8x128xf32, #tpu.memory_space<vmem>>, %arg5: memref<8x128xf32, #tpu.memory_space<vmem>>) attributes {dimension_semantics = [#tpu.dimension_semantics<arbitrary>], iteration_bounds = array<i64: 1>, scalar_prefetch = 0 : i64, scratch_operands = 2 : i64, tpu.core_type = #tpu.core_type<tc>, window_params = [{transform_indices = @transform_0, window_bounds = array<i64: 8, 8, 512>}, {pipeline_mode = #tpu.pipeline_mode<synchronous>, transform_indices = @transform_1, window_bounds = array<i64: 128, 512>}, {pipeline_mode = #tpu.pipeline_mode<synchronous>, transform_indices = @transform_2, window_bounds = array<i64: 8, 128>}]} {
    %c0_i32 = arith.constant 0 : i32
    %0 = arith.cmpi eq, %arg0, %c0_i32 : i32
    %1 = arith.extui %0 : i1 to i32
    %c0_i32_0 = arith.constant 0 : i32
    %2 = arith.cmpi ne, %1, %c0_i32_0 : i32
    scf.if %2 {
      %cst_116 = arith.constant 0.000000e+00 : f32
      %279 = vector.broadcast %cst_116 : f32 to vector<8x128xf32>
      %c0_117 = arith.constant 0 : index
      %c0_118 = arith.constant 0 : index
      %280 = vector.load %arg4[%c0_117, %c0_118] : memref<8x128xf32, #tpu.memory_space<vmem>>, vector<8x128xf32>
      tpu.vector_store %arg4[%c0_117, %c0_118], %279 {strides = array<i32>} : memref<8x128xf32, #tpu.memory_space<vmem>>, vector<8x128xf32>,
      %cst_119 = arith.constant 0.000000e+00 : f32
      %281 = vector.broadcast %cst_119 : f32 to vector<8x128xf32>
      %c0_120 = arith.constant 0 : index
      %c0_121 = arith.constant 0 : index
      %282 = vector.load %arg5[%c0_120, %c0_121] : memref<8x128xf32, #tpu.memory_space<vmem>>, vector<8x128xf32>
      tpu.vector_store %arg5[%c0_120, %c0_121], %281 {strides = array<i32>} : memref<8x128xf32, #tpu.memory_space<vmem>>, vector<8x128xf32>,
    } else {
    }
    %c0 = arith.constant 0 : index
    %c0_1 = arith.constant 0 : index
    %3 = vector.load %arg2[%c0, %c0_1] : memref<128x512xf32, #tpu.memory_space<vmem>>, vector<128x512xf32>
    %c0_i32_2 = arith.constant 0 : i32
    %c0_3 = arith.constant 0 : index
    %c0_4 = arith.constant 0 : index
    %4 = vector.load %arg4[%c0_3, %c0_4] : memref<8x128xf32, #tpu.memory_space<vmem>>, vector<8x128xf32>
    %c0_5 = arith.constant 0 : index
    %c0_6 = arith.constant 0 : index
    %5 = vector.load %arg5[%c0_5, %c0_6] : memref<8x128xf32, #tpu.memory_space<vmem>>, vector<8x128xf32>
    %6 = arith.index_cast %c0_i32_2 : i32 to index
    %c0_7 = arith.constant 0 : index
    %c0_8 = arith.constant 0 : index
    %7 = vector.load %arg1[%6, %c0_7, %c0_8] : memref<8x8x512xf32, #tpu.memory_space<vmem>>, vector<1x8x512xf32>
    %8 = vector.shape_cast %7 : vector<1x8x512xf32> to vector<8x512xf32>
    %cst = arith.constant dense<0.000000e+00> : vector<8x512xf32>
    %9 = tpu.matmul %4, %3, %cst {dimension_numbers = #tpu.dot_dimension_numbers<[1], [0], [0], [1], [0, 0, 1, 1], [], []>} : vector<8x128xf32>, vector<128x512xf32>, vector<8x512xf32> -> vector<8x512xf32>
    %10 = arith.addf %8, %9 : vector<8x512xf32>
    %11 = vector.extract_strided_slice %10 {offsets = [0, 0], sizes = [8, 128], strides = [1, 1]} : vector<8x512xf32> to vector<8x128xf32>
    %12 = arith.negf %11 : vector<8x128xf32>
    %13 = math.exp %12 : vector<8x128xf32>
    %cst_9 = arith.constant 1.000000e+00 : f32
    %14 = vector.broadcast %cst_9 : f32 to vector<8x128xf32>
    %15 = arith.addf %14, %13 : vector<8x128xf32>
    %16 = arith.divf %14, %15 : vector<8x128xf32>
    %17 = vector.extract_strided_slice %10 {offsets = [0, 128], sizes = [8, 128], strides = [1, 1]} : vector<8x512xf32> to vector<8x128xf32>
    %18 = arith.negf %17 : vector<8x128xf32>
    %19 = math.exp %18 : vector<8x128xf32>
    %cst_10 = arith.constant 1.000000e+00 : f32
    %20 = vector.broadcast %cst_10 : f32 to vector<8x128xf32>
    %21 = arith.addf %20, %19 : vector<8x128xf32>
    %22 = arith.divf %20, %21 : vector<8x128xf32>
    %23 = vector.extract_strided_slice %10 {offsets = [0, 256], sizes = [8, 128], strides = [1, 1]} : vector<8x512xf32> to vector<8x128xf32>
    %24 = math.tanh %23 : vector<8x128xf32>
    %25 = vector.extract_strided_slice %10 {offsets = [0, 384], sizes = [8, 128], strides = [1, 1]} : vector<8x512xf32> to vector<8x128xf32>
    %26 = arith.negf %25 : vector<8x128xf32>
    %27 = math.exp %26 : vector<8x128xf32>
    %cst_11 = arith.constant 1.000000e+00 : f32
    %28 = vector.broadcast %cst_11 : f32 to vector<8x128xf32>
    %29 = arith.addf %28, %27 : vector<8x128xf32>
    %30 = arith.divf %28, %29 : vector<8x128xf32>
    %31 = arith.mulf %22, %5 : vector<8x128xf32>
    %32 = arith.mulf %16, %24 : vector<8x128xf32>
    %33 = arith.addf %31, %32 : vector<8x128xf32>
    %34 = math.tanh %33 : vector<8x128xf32>
    %35 = arith.mulf %30, %34 : vector<8x128xf32>
    %c0_12 = arith.constant 0 : index
    %c0_13 = arith.constant 0 : index
    %36 = vector.load %arg5[%c0_12, %c0_13] : memref<8x128xf32, #tpu.memory_space<vmem>>, vector<8x128xf32>
    tpu.vector_store %arg5[%c0_12, %c0_13], %33 {strides = array<i32>} : memref<8x128xf32, #tpu.memory_space<vmem>>, vector<8x128xf32>,
    %c0_14 = arith.constant 0 : index
    %c0_15 = arith.constant 0 : index
    %37 = vector.load %arg4[%c0_14, %c0_15] : memref<8x128xf32, #tpu.memory_space<vmem>>, vector<8x128xf32>
    tpu.vector_store %arg4[%c0_14, %c0_15], %35 {strides = array<i32>} : memref<8x128xf32, #tpu.memory_space<vmem>>, vector<8x128xf32>,
    %c1_i32 = arith.constant 1 : i32
    %c0_16 = arith.constant 0 : index
    %c0_17 = arith.constant 0 : index
    %38 = vector.load %arg4[%c0_16, %c0_17] : memref<8x128xf32, #tpu.memory_space<vmem>>, vector<8x128xf32>
    %c0_18 = arith.constant 0 : index
    %c0_19 = arith.constant 0 : index
    %39 = vector.load %arg5[%c0_18, %c0_19] : memref<8x128xf32, #tpu.memory_space<vmem>>, vector<8x128xf32>
    %40 = arith.index_cast %c1_i32 : i32 to index
    %c0_20 = arith.constant 0 : index
    %c0_21 = arith.constant 0 : index
    %41 = vector.load %arg1[%40, %c0_20, %c0_21] : memref<8x8x512xf32, #tpu.memory_space<vmem>>, vector<1x8x512xf32>
    %42 = vector.shape_cast %41 : vector<1x8x512xf32> to vector<8x512xf32>
    %cst_22 = arith.constant dense<0.000000e+00> : vector<8x512xf32>
    %43 = tpu.matmul %38, %3, %cst_22 {dimension_numbers = #tpu.dot_dimension_numbers<[1], [0], [0], [1], [0, 0, 1, 1], [], []>} : vector<8x128xf32>, vector<128x512xf32>, vector<8x512xf32> -> vector<8x512xf32>
    %44 = arith.addf %42, %43 : vector<8x512xf32>
    %45 = vector.extract_strided_slice %44 {offsets = [0, 0], sizes = [8, 128], strides = [1, 1]} : vector<8x512xf32> to vector<8x128xf32>
    %46 = arith.negf %45 : vector<8x128xf32>
    %47 = math.exp %46 : vector<8x128xf32>
    %cst_23 = arith.constant 1.000000e+00 : f32
    %48 = vector.broadcast %cst_23 : f32 to vector<8x128xf32>
    %49 = arith.addf %48, %47 : vector<8x128xf32>
    %50 = arith.divf %48, %49 : vector<8x128xf32>
    %51 = vector.extract_strided_slice %44 {offsets = [0, 128], sizes = [8, 128], strides = [1, 1]} : vector<8x512xf32> to vector<8x128xf32>
    %52 = arith.negf %51 : vector<8x128xf32>
    %53 = math.exp %52 : vector<8x128xf32>
    %cst_24 = arith.constant 1.000000e+00 : f32
    %54 = vector.broadcast %cst_24 : f32 to vector<8x128xf32>
    %55 = arith.addf %54, %53 : vector<8x128xf32>
    %56 = arith.divf %54, %55 : vector<8x128xf32>
    %57 = vector.extract_strided_slice %44 {offsets = [0, 256], sizes = [8, 128], strides = [1, 1]} : vector<8x512xf32> to vector<8x128xf32>
    %58 = math.tanh %57 : vector<8x128xf32>
    %59 = vector.extract_strided_slice %44 {offsets = [0, 384], sizes = [8, 128], strides = [1, 1]} : vector<8x512xf32> to vector<8x128xf32>
    %60 = arith.negf %59 : vector<8x128xf32>
    %61 = math.exp %60 : vector<8x128xf32>
    %cst_25 = arith.constant 1.000000e+00 : f32
    %62 = vector.broadcast %cst_25 : f32 to vector<8x128xf32>
    %63 = arith.addf %62, %61 : vector<8x128xf32>
    %64 = arith.divf %62, %63 : vector<8x128xf32>
    %65 = arith.mulf %56, %39 : vector<8x128xf32>
    %66 = arith.mulf %50, %58 : vector<8x128xf32>
    %67 = arith.addf %65, %66 : vector<8x128xf32>
    %68 = math.tanh %67 : vector<8x128xf32>
    %69 = arith.mulf %64, %68 : vector<8x128xf32>
    %c0_26 = arith.constant 0 : index
    %c0_27 = arith.constant 0 : index
    %70 = vector.load %arg5[%c0_26, %c0_27] : memref<8x128xf32, #tpu.memory_space<vmem>>, vector<8x128xf32>
    tpu.vector_store %arg5[%c0_26, %c0_27], %67 {strides = array<i32>} : memref<8x128xf32, #tpu.memory_space<vmem>>, vector<8x128xf32>,
    %c0_28 = arith.constant 0 : index
    %c0_29 = arith.constant 0 : index
    %71 = vector.load %arg4[%c0_28, %c0_29] : memref<8x128xf32, #tpu.memory_space<vmem>>, vector<8x128xf32>
    tpu.vector_store %arg4[%c0_28, %c0_29], %69 {strides = array<i32>} : memref<8x128xf32, #tpu.memory_space<vmem>>, vector<8x128xf32>,
    %c2_i32 = arith.constant 2 : i32
    %c0_30 = arith.constant 0 : index
    %c0_31 = arith.constant 0 : index
    %72 = vector.load %arg4[%c0_30, %c0_31] : memref<8x128xf32, #tpu.memory_space<vmem>>, vector<8x128xf32>
    %c0_32 = arith.constant 0 : index
    %c0_33 = arith.constant 0 : index
    %73 = vector.load %arg5[%c0_32, %c0_33] : memref<8x128xf32, #tpu.memory_space<vmem>>, vector<8x128xf32>
    %74 = arith.index_cast %c2_i32 : i32 to index
    %c0_34 = arith.constant 0 : index
    %c0_35 = arith.constant 0 : index
    %75 = vector.load %arg1[%74, %c0_34, %c0_35] : memref<8x8x512xf32, #tpu.memory_space<vmem>>, vector<1x8x512xf32>
    %76 = vector.shape_cast %75 : vector<1x8x512xf32> to vector<8x512xf32>
    %cst_36 = arith.constant dense<0.000000e+00> : vector<8x512xf32>
    %77 = tpu.matmul %72, %3, %cst_36 {dimension_numbers = #tpu.dot_dimension_numbers<[1], [0], [0], [1], [0, 0, 1, 1], [], []>} : vector<8x128xf32>, vector<128x512xf32>, vector<8x512xf32> -> vector<8x512xf32>
    %78 = arith.addf %76, %77 : vector<8x512xf32>
    %79 = vector.extract_strided_slice %78 {offsets = [0, 0], sizes = [8, 128], strides = [1, 1]} : vector<8x512xf32> to vector<8x128xf32>
    %80 = arith.negf %79 : vector<8x128xf32>
    %81 = math.exp %80 : vector<8x128xf32>
    %cst_37 = arith.constant 1.000000e+00 : f32
    %82 = vector.broadcast %cst_37 : f32 to vector<8x128xf32>
    %83 = arith.addf %82, %81 : vector<8x128xf32>
    %84 = arith.divf %82, %83 : vector<8x128xf32>
    %85 = vector.extract_strided_slice %78 {offsets = [0, 128], sizes = [8, 128], strides = [1, 1]} : vector<8x512xf32> to vector<8x128xf32>
    %86 = arith.negf %85 : vector<8x128xf32>
    %87 = math.exp %86 : vector<8x128xf32>
    %cst_38 = arith.constant 1.000000e+00 : f32
    %88 = vector.broadcast %cst_38 : f32 to vector<8x128xf32>
    %89 = arith.addf %88, %87 : vector<8x128xf32>
    %90 = arith.divf %88, %89 : vector<8x128xf32>
    %91 = vector.extract_strided_slice %78 {offsets = [0, 256], sizes = [8, 128], strides = [1, 1]} : vector<8x512xf32> to vector<8x128xf32>
    %92 = math.tanh %91 : vector<8x128xf32>
    %93 = vector.extract_strided_slice %78 {offsets = [0, 384], sizes = [8, 128], strides = [1, 1]} : vector<8x512xf32> to vector<8x128xf32>
    %94 = arith.negf %93 : vector<8x128xf32>
    %95 = math.exp %94 : vector<8x128xf32>
    %cst_39 = arith.constant 1.000000e+00 : f32
    %96 = vector.broadcast %cst_39 : f32 to vector<8x128xf32>
    %97 = arith.addf %96, %95 : vector<8x128xf32>
    %98 = arith.divf %96, %97 : vector<8x128xf32>
    %99 = arith.mulf %90, %73 : vector<8x128xf32>
    %100 = arith.mulf %84, %92 : vector<8x128xf32>
    %101 = arith.addf %99, %100 : vector<8x128xf32>
    %102 = math.tanh %101 : vector<8x128xf32>
    %103 = arith.mulf %98, %102 : vector<8x128xf32>
    %c0_40 = arith.constant 0 : index
    %c0_41 = arith.constant 0 : index
    %104 = vector.load %arg5[%c0_40, %c0_41] : memref<8x128xf32, #tpu.memory_space<vmem>>, vector<8x128xf32>
    tpu.vector_store %arg5[%c0_40, %c0_41], %101 {strides = array<i32>} : memref<8x128xf32, #tpu.memory_space<vmem>>, vector<8x128xf32>,
    %c0_42 = arith.constant 0 : index
    %c0_43 = arith.constant 0 : index
    %105 = vector.load %arg4[%c0_42, %c0_43] : memref<8x128xf32, #tpu.memory_space<vmem>>, vector<8x128xf32>
    tpu.vector_store %arg4[%c0_42, %c0_43], %103 {strides = array<i32>} : memref<8x128xf32, #tpu.memory_space<vmem>>, vector<8x128xf32>,
    %c3_i32 = arith.constant 3 : i32
    %c0_44 = arith.constant 0 : index
    %c0_45 = arith.constant 0 : index
    %106 = vector.load %arg4[%c0_44, %c0_45] : memref<8x128xf32, #tpu.memory_space<vmem>>, vector<8x128xf32>
    %c0_46 = arith.constant 0 : index
    %c0_47 = arith.constant 0 : index
    %107 = vector.load %arg5[%c0_46, %c0_47] : memref<8x128xf32, #tpu.memory_space<vmem>>, vector<8x128xf32>
    %108 = arith.index_cast %c3_i32 : i32 to index
    %c0_48 = arith.constant 0 : index
    %c0_49 = arith.constant 0 : index
    %109 = vector.load %arg1[%108, %c0_48, %c0_49] : memref<8x8x512xf32, #tpu.memory_space<vmem>>, vector<1x8x512xf32>
    %110 = vector.shape_cast %109 : vector<1x8x512xf32> to vector<8x512xf32>
    %cst_50 = arith.constant dense<0.000000e+00> : vector<8x512xf32>
    %111 = tpu.matmul %106, %3, %cst_50 {dimension_numbers = #tpu.dot_dimension_numbers<[1], [0], [0], [1], [0, 0, 1, 1], [], []>} : vector<8x128xf32>, vector<128x512xf32>, vector<8x512xf32> -> vector<8x512xf32>
    %112 = arith.addf %110, %111 : vector<8x512xf32>
    %113 = vector.extract_strided_slice %112 {offsets = [0, 0], sizes = [8, 128], strides = [1, 1]} : vector<8x512xf32> to vector<8x128xf32>
    %114 = arith.negf %113 : vector<8x128xf32>
    %115 = math.exp %114 : vector<8x128xf32>
    %cst_51 = arith.constant 1.000000e+00 : f32
    %116 = vector.broadcast %cst_51 : f32 to vector<8x128xf32>
    %117 = arith.addf %116, %115 : vector<8x128xf32>
    %118 = arith.divf %116, %117 : vector<8x128xf32>
    %119 = vector.extract_strided_slice %112 {offsets = [0, 128], sizes = [8, 128], strides = [1, 1]} : vector<8x512xf32> to vector<8x128xf32>
    %120 = arith.negf %119 : vector<8x128xf32>
    %121 = math.exp %120 : vector<8x128xf32>
    %cst_52 = arith.constant 1.000000e+00 : f32
    %122 = vector.broadcast %cst_52 : f32 to vector<8x128xf32>
    %123 = arith.addf %122, %121 : vector<8x128xf32>
    %124 = arith.divf %122, %123 : vector<8x128xf32>
    %125 = vector.extract_strided_slice %112 {offsets = [0, 256], sizes = [8, 128], strides = [1, 1]} : vector<8x512xf32> to vector<8x128xf32>
    %126 = math.tanh %125 : vector<8x128xf32>
    %127 = vector.extract_strided_slice %112 {offsets = [0, 384], sizes = [8, 128], strides = [1, 1]} : vector<8x512xf32> to vector<8x128xf32>
    %128 = arith.negf %127 : vector<8x128xf32>
    %129 = math.exp %128 : vector<8x128xf32>
    %cst_53 = arith.constant 1.000000e+00 : f32
    %130 = vector.broadcast %cst_53 : f32 to vector<8x128xf32>
    %131 = arith.addf %130, %129 : vector<8x128xf32>
    %132 = arith.divf %130, %131 : vector<8x128xf32>
    %133 = arith.mulf %124, %107 : vector<8x128xf32>
    %134 = arith.mulf %118, %126 : vector<8x128xf32>
    %135 = arith.addf %133, %134 : vector<8x128xf32>
    %136 = math.tanh %135 : vector<8x128xf32>
    %137 = arith.mulf %132, %136 : vector<8x128xf32>
    %c0_54 = arith.constant 0 : index
    %c0_55 = arith.constant 0 : index
    %138 = vector.load %arg5[%c0_54, %c0_55] : memref<8x128xf32, #tpu.memory_space<vmem>>, vector<8x128xf32>
    tpu.vector_store %arg5[%c0_54, %c0_55], %135 {strides = array<i32>} : memref<8x128xf32, #tpu.memory_space<vmem>>, vector<8x128xf32>,
    %c0_56 = arith.constant 0 : index
    %c0_57 = arith.constant 0 : index
    %139 = vector.load %arg4[%c0_56, %c0_57] : memref<8x128xf32, #tpu.memory_space<vmem>>, vector<8x128xf32>
    tpu.vector_store %arg4[%c0_56, %c0_57], %137 {strides = array<i32>} : memref<8x128xf32, #tpu.memory_space<vmem>>, vector<8x128xf32>,
    %c4_i32 = arith.constant 4 : i32
    %c0_58 = arith.constant 0 : index
    %c0_59 = arith.constant 0 : index
    %140 = vector.load %arg4[%c0_58, %c0_59] : memref<8x128xf32, #tpu.memory_space<vmem>>, vector<8x128xf32>
    %c0_60 = arith.constant 0 : index
    %c0_61 = arith.constant 0 : index
    %141 = vector.load %arg5[%c0_60, %c0_61] : memref<8x128xf32, #tpu.memory_space<vmem>>, vector<8x128xf32>
    %142 = arith.index_cast %c4_i32 : i32 to index
    %c0_62 = arith.constant 0 : index
    %c0_63 = arith.constant 0 : index
    %143 = vector.load %arg1[%142, %c0_62, %c0_63] : memref<8x8x512xf32, #tpu.memory_space<vmem>>, vector<1x8x512xf32>
    %144 = vector.shape_cast %143 : vector<1x8x512xf32> to vector<8x512xf32>
    %cst_64 = arith.constant dense<0.000000e+00> : vector<8x512xf32>
    %145 = tpu.matmul %140, %3, %cst_64 {dimension_numbers = #tpu.dot_dimension_numbers<[1], [0], [0], [1], [0, 0, 1, 1], [], []>} : vector<8x128xf32>, vector<128x512xf32>, vector<8x512xf32> -> vector<8x512xf32>
    %146 = arith.addf %144, %145 : vector<8x512xf32>
    %147 = vector.extract_strided_slice %146 {offsets = [0, 0], sizes = [8, 128], strides = [1, 1]} : vector<8x512xf32> to vector<8x128xf32>
    %148 = arith.negf %147 : vector<8x128xf32>
    %149 = math.exp %148 : vector<8x128xf32>
    %cst_65 = arith.constant 1.000000e+00 : f32
    %150 = vector.broadcast %cst_65 : f32 to vector<8x128xf32>
    %151 = arith.addf %150, %149 : vector<8x128xf32>
    %152 = arith.divf %150, %151 : vector<8x128xf32>
    %153 = vector.extract_strided_slice %146 {offsets = [0, 128], sizes = [8, 128], strides = [1, 1]} : vector<8x512xf32> to vector<8x128xf32>
    %154 = arith.negf %153 : vector<8x128xf32>
    %155 = math.exp %154 : vector<8x128xf32>
    %cst_66 = arith.constant 1.000000e+00 : f32
    %156 = vector.broadcast %cst_66 : f32 to vector<8x128xf32>
    %157 = arith.addf %156, %155 : vector<8x128xf32>
    %158 = arith.divf %156, %157 : vector<8x128xf32>
    %159 = vector.extract_strided_slice %146 {offsets = [0, 256], sizes = [8, 128], strides = [1, 1]} : vector<8x512xf32> to vector<8x128xf32>
    %160 = math.tanh %159 : vector<8x128xf32>
    %161 = vector.extract_strided_slice %146 {offsets = [0, 384], sizes = [8, 128], strides = [1, 1]} : vector<8x512xf32> to vector<8x128xf32>
    %162 = arith.negf %161 : vector<8x128xf32>
    %163 = math.exp %162 : vector<8x128xf32>
    %cst_67 = arith.constant 1.000000e+00 : f32
    %164 = vector.broadcast %cst_67 : f32 to vector<8x128xf32>
    %165 = arith.addf %164, %163 : vector<8x128xf32>
    %166 = arith.divf %164, %165 : vector<8x128xf32>
    %167 = arith.mulf %158, %141 : vector<8x128xf32>
    %168 = arith.mulf %152, %160 : vector<8x128xf32>
    %169 = arith.addf %167, %168 : vector<8x128xf32>
    %170 = math.tanh %169 : vector<8x128xf32>
    %171 = arith.mulf %166, %170 : vector<8x128xf32>
    %c0_68 = arith.constant 0 : index
    %c0_69 = arith.constant 0 : index
    %172 = vector.load %arg5[%c0_68, %c0_69] : memref<8x128xf32, #tpu.memory_space<vmem>>, vector<8x128xf32>
    tpu.vector_store %arg5[%c0_68, %c0_69], %169 {strides = array<i32>} : memref<8x128xf32, #tpu.memory_space<vmem>>, vector<8x128xf32>,
    %c0_70 = arith.constant 0 : index
    %c0_71 = arith.constant 0 : index
    %173 = vector.load %arg4[%c0_70, %c0_71] : memref<8x128xf32, #tpu.memory_space<vmem>>, vector<8x128xf32>
    tpu.vector_store %arg4[%c0_70, %c0_71], %171 {strides = array<i32>} : memref<8x128xf32, #tpu.memory_space<vmem>>, vector<8x128xf32>,
    %c5_i32 = arith.constant 5 : i32
    %c0_72 = arith.constant 0 : index
    %c0_73 = arith.constant 0 : index
    %174 = vector.load %arg4[%c0_72, %c0_73] : memref<8x128xf32, #tpu.memory_space<vmem>>, vector<8x128xf32>
    %c0_74 = arith.constant 0 : index
    %c0_75 = arith.constant 0 : index
    %175 = vector.load %arg5[%c0_74, %c0_75] : memref<8x128xf32, #tpu.memory_space<vmem>>, vector<8x128xf32>
    %176 = arith.index_cast %c5_i32 : i32 to index
    %c0_76 = arith.constant 0 : index
    %c0_77 = arith.constant 0 : index
    %177 = vector.load %arg1[%176, %c0_76, %c0_77] : memref<8x8x512xf32, #tpu.memory_space<vmem>>, vector<1x8x512xf32>
    %178 = vector.shape_cast %177 : vector<1x8x512xf32> to vector<8x512xf32>
    %cst_78 = arith.constant dense<0.000000e+00> : vector<8x512xf32>
    %179 = tpu.matmul %174, %3, %cst_78 {dimension_numbers = #tpu.dot_dimension_numbers<[1], [0], [0], [1], [0, 0, 1, 1], [], []>} : vector<8x128xf32>, vector<128x512xf32>, vector<8x512xf32> -> vector<8x512xf32>
    %180 = arith.addf %178, %179 : vector<8x512xf32>
    %181 = vector.extract_strided_slice %180 {offsets = [0, 0], sizes = [8, 128], strides = [1, 1]} : vector<8x512xf32> to vector<8x128xf32>
    %182 = arith.negf %181 : vector<8x128xf32>
    %183 = math.exp %182 : vector<8x128xf32>
    %cst_79 = arith.constant 1.000000e+00 : f32
    %184 = vector.broadcast %cst_79 : f32 to vector<8x128xf32>
    %185 = arith.addf %184, %183 : vector<8x128xf32>
    %186 = arith.divf %184, %185 : vector<8x128xf32>
    %187 = vector.extract_strided_slice %180 {offsets = [0, 128], sizes = [8, 128], strides = [1, 1]} : vector<8x512xf32> to vector<8x128xf32>
    %188 = arith.negf %187 : vector<8x128xf32>
    %189 = math.exp %188 : vector<8x128xf32>
    %cst_80 = arith.constant 1.000000e+00 : f32
    %190 = vector.broadcast %cst_80 : f32 to vector<8x128xf32>
    %191 = arith.addf %190, %189 : vector<8x128xf32>
    %192 = arith.divf %190, %191 : vector<8x128xf32>
    %193 = vector.extract_strided_slice %180 {offsets = [0, 256], sizes = [8, 128], strides = [1, 1]} : vector<8x512xf32> to vector<8x128xf32>
    %194 = math.tanh %193 : vector<8x128xf32>
    %195 = vector.extract_strided_slice %180 {offsets = [0, 384], sizes = [8, 128], strides = [1, 1]} : vector<8x512xf32> to vector<8x128xf32>
    %196 = arith.negf %195 : vector<8x128xf32>
    %197 = math.exp %196 : vector<8x128xf32>
    %cst_81 = arith.constant 1.000000e+00 : f32
    %198 = vector.broadcast %cst_81 : f32 to vector<8x128xf32>
    %199 = arith.addf %198, %197 : vector<8x128xf32>
    %200 = arith.divf %198, %199 : vector<8x128xf32>
    %201 = arith.mulf %192, %175 : vector<8x128xf32>
    %202 = arith.mulf %186, %194 : vector<8x128xf32>
    %203 = arith.addf %201, %202 : vector<8x128xf32>
    %204 = math.tanh %203 : vector<8x128xf32>
    %205 = arith.mulf %200, %204 : vector<8x128xf32>
    %c0_82 = arith.constant 0 : index
    %c0_83 = arith.constant 0 : index
    %206 = vector.load %arg5[%c0_82, %c0_83] : memref<8x128xf32, #tpu.memory_space<vmem>>, vector<8x128xf32>
    tpu.vector_store %arg5[%c0_82, %c0_83], %203 {strides = array<i32>} : memref<8x128xf32, #tpu.memory_space<vmem>>, vector<8x128xf32>,
    %c0_84 = arith.constant 0 : index
    %c0_85 = arith.constant 0 : index
    %207 = vector.load %arg4[%c0_84, %c0_85] : memref<8x128xf32, #tpu.memory_space<vmem>>, vector<8x128xf32>
    tpu.vector_store %arg4[%c0_84, %c0_85], %205 {strides = array<i32>} : memref<8x128xf32, #tpu.memory_space<vmem>>, vector<8x128xf32>,
    %c6_i32 = arith.constant 6 : i32
    %c0_86 = arith.constant 0 : index
    %c0_87 = arith.constant 0 : index
    %208 = vector.load %arg4[%c0_86, %c0_87] : memref<8x128xf32, #tpu.memory_space<vmem>>, vector<8x128xf32>
    %c0_88 = arith.constant 0 : index
    %c0_89 = arith.constant 0 : index
    %209 = vector.load %arg5[%c0_88, %c0_89] : memref<8x128xf32, #tpu.memory_space<vmem>>, vector<8x128xf32>
    %210 = arith.index_cast %c6_i32 : i32 to index
    %c0_90 = arith.constant 0 : index
    %c0_91 = arith.constant 0 : index
    %211 = vector.load %arg1[%210, %c0_90, %c0_91] : memref<8x8x512xf32, #tpu.memory_space<vmem>>, vector<1x8x512xf32>
    %212 = vector.shape_cast %211 : vector<1x8x512xf32> to vector<8x512xf32>
    %cst_92 = arith.constant dense<0.000000e+00> : vector<8x512xf32>
    %213 = tpu.matmul %208, %3, %cst_92 {dimension_numbers = #tpu.dot_dimension_numbers<[1], [0], [0], [1], [0, 0, 1, 1], [], []>} : vector<8x128xf32>, vector<128x512xf32>, vector<8x512xf32> -> vector<8x512xf32>
    %214 = arith.addf %212, %213 : vector<8x512xf32>
    %215 = vector.extract_strided_slice %214 {offsets = [0, 0], sizes = [8, 128], strides = [1, 1]} : vector<8x512xf32> to vector<8x128xf32>
    %216 = arith.negf %215 : vector<8x128xf32>
    %217 = math.exp %216 : vector<8x128xf32>
    %cst_93 = arith.constant 1.000000e+00 : f32
    %218 = vector.broadcast %cst_93 : f32 to vector<8x128xf32>
    %219 = arith.addf %218, %217 : vector<8x128xf32>
    %220 = arith.divf %218, %219 : vector<8x128xf32>
    %221 = vector.extract_strided_slice %214 {offsets = [0, 128], sizes = [8, 128], strides = [1, 1]} : vector<8x512xf32> to vector<8x128xf32>
    %222 = arith.negf %221 : vector<8x128xf32>
    %223 = math.exp %222 : vector<8x128xf32>
    %cst_94 = arith.constant 1.000000e+00 : f32
    %224 = vector.broadcast %cst_94 : f32 to vector<8x128xf32>
    %225 = arith.addf %224, %223 : vector<8x128xf32>
    %226 = arith.divf %224, %225 : vector<8x128xf32>
    %227 = vector.extract_strided_slice %214 {offsets = [0, 256], sizes = [8, 128], strides = [1, 1]} : vector<8x512xf32> to vector<8x128xf32>
    %228 = math.tanh %227 : vector<8x128xf32>
    %229 = vector.extract_strided_slice %214 {offsets = [0, 384], sizes = [8, 128], strides = [1, 1]} : vector<8x512xf32> to vector<8x128xf32>
    %230 = arith.negf %229 : vector<8x128xf32>
    %231 = math.exp %230 : vector<8x128xf32>
    %cst_95 = arith.constant 1.000000e+00 : f32
    %232 = vector.broadcast %cst_95 : f32 to vector<8x128xf32>
    %233 = arith.addf %232, %231 : vector<8x128xf32>
    %234 = arith.divf %232, %233 : vector<8x128xf32>
    %235 = arith.mulf %226, %209 : vector<8x128xf32>
    %236 = arith.mulf %220, %228 : vector<8x128xf32>
    %237 = arith.addf %235, %236 : vector<8x128xf32>
    %238 = math.tanh %237 : vector<8x128xf32>
    %239 = arith.mulf %234, %238 : vector<8x128xf32>
    %c0_96 = arith.constant 0 : index
    %c0_97 = arith.constant 0 : index
    %240 = vector.load %arg5[%c0_96, %c0_97] : memref<8x128xf32, #tpu.memory_space<vmem>>, vector<8x128xf32>
    tpu.vector_store %arg5[%c0_96, %c0_97], %237 {strides = array<i32>} : memref<8x128xf32, #tpu.memory_space<vmem>>, vector<8x128xf32>,
    %c0_98 = arith.constant 0 : index
    %c0_99 = arith.constant 0 : index
    %241 = vector.load %arg4[%c0_98, %c0_99] : memref<8x128xf32, #tpu.memory_space<vmem>>, vector<8x128xf32>
    tpu.vector_store %arg4[%c0_98, %c0_99], %239 {strides = array<i32>} : memref<8x128xf32, #tpu.memory_space<vmem>>, vector<8x128xf32>,
    %c7_i32 = arith.constant 7 : i32
    %c0_100 = arith.constant 0 : index
    %c0_101 = arith.constant 0 : index
    %242 = vector.load %arg4[%c0_100, %c0_101] : memref<8x128xf32, #tpu.memory_space<vmem>>, vector<8x128xf32>
    %c0_102 = arith.constant 0 : index
    %c0_103 = arith.constant 0 : index
    %243 = vector.load %arg5[%c0_102, %c0_103] : memref<8x128xf32, #tpu.memory_space<vmem>>, vector<8x128xf32>
    %244 = arith.index_cast %c7_i32 : i32 to index
    %c0_104 = arith.constant 0 : index
    %c0_105 = arith.constant 0 : index
    %245 = vector.load %arg1[%244, %c0_104, %c0_105] : memref<8x8x512xf32, #tpu.memory_space<vmem>>, vector<1x8x512xf32>
    %246 = vector.shape_cast %245 : vector<1x8x512xf32> to vector<8x512xf32>
    %cst_106 = arith.constant dense<0.000000e+00> : vector<8x512xf32>
    %247 = tpu.matmul %242, %3, %cst_106 {dimension_numbers = #tpu.dot_dimension_numbers<[1], [0], [0], [1], [0, 0, 1, 1], [], []>} : vector<8x128xf32>, vector<128x512xf32>, vector<8x512xf32> -> vector<8x512xf32>
    %248 = arith.addf %246, %247 : vector<8x512xf32>
    %249 = vector.extract_strided_slice %248 {offsets = [0, 0], sizes = [8, 128], strides = [1, 1]} : vector<8x512xf32> to vector<8x128xf32>
    %250 = arith.negf %249 : vector<8x128xf32>
    %251 = math.exp %250 : vector<8x128xf32>
    %cst_107 = arith.constant 1.000000e+00 : f32
    %252 = vector.broadcast %cst_107 : f32 to vector<8x128xf32>
    %253 = arith.addf %252, %251 : vector<8x128xf32>
    %254 = arith.divf %252, %253 : vector<8x128xf32>
    %255 = vector.extract_strided_slice %248 {offsets = [0, 128], sizes = [8, 128], strides = [1, 1]} : vector<8x512xf32> to vector<8x128xf32>
    %256 = arith.negf %255 : vector<8x128xf32>
    %257 = math.exp %256 : vector<8x128xf32>
    %cst_108 = arith.constant 1.000000e+00 : f32
    %258 = vector.broadcast %cst_108 : f32 to vector<8x128xf32>
    %259 = arith.addf %258, %257 : vector<8x128xf32>
    %260 = arith.divf %258, %259 : vector<8x128xf32>
    %261 = vector.extract_strided_slice %248 {offsets = [0, 256], sizes = [8, 128], strides = [1, 1]} : vector<8x512xf32> to vector<8x128xf32>
    %262 = math.tanh %261 : vector<8x128xf32>
    %263 = vector.extract_strided_slice %248 {offsets = [0, 384], sizes = [8, 128], strides = [1, 1]} : vector<8x512xf32> to vector<8x128xf32>
    %264 = arith.negf %263 : vector<8x128xf32>
    %265 = math.exp %264 : vector<8x128xf32>
    %cst_109 = arith.constant 1.000000e+00 : f32
    %266 = vector.broadcast %cst_109 : f32 to vector<8x128xf32>
    %267 = arith.addf %266, %265 : vector<8x128xf32>
    %268 = arith.divf %266, %267 : vector<8x128xf32>
    %269 = arith.mulf %260, %243 : vector<8x128xf32>
    %270 = arith.mulf %254, %262 : vector<8x128xf32>
    %271 = arith.addf %269, %270 : vector<8x128xf32>
    %272 = math.tanh %271 : vector<8x128xf32>
    %273 = arith.mulf %268, %272 : vector<8x128xf32>
    %c0_110 = arith.constant 0 : index
    %c0_111 = arith.constant 0 : index
    %274 = vector.load %arg5[%c0_110, %c0_111] : memref<8x128xf32, #tpu.memory_space<vmem>>, vector<8x128xf32>
    tpu.vector_store %arg5[%c0_110, %c0_111], %271 {strides = array<i32>} : memref<8x128xf32, #tpu.memory_space<vmem>>, vector<8x128xf32>,
    %c0_112 = arith.constant 0 : index
    %c0_113 = arith.constant 0 : index
    %275 = vector.load %arg4[%c0_112, %c0_113] : memref<8x128xf32, #tpu.memory_space<vmem>>, vector<8x128xf32>
    tpu.vector_store %arg4[%c0_112, %c0_113], %273 {strides = array<i32>} : memref<8x128xf32, #tpu.memory_space<vmem>>, vector<8x128xf32>,
    %c8_i32 = arith.constant 8 : i32
    %c0_i32_114 = arith.constant 0 : i32
    %276 = arith.cmpi eq, %arg0, %c0_i32_114 : i32
    %277 = arith.extui %276 : i1 to i32
    %c0_i32_115 = arith.constant 0 : i32
    %278 = arith.cmpi ne, %277, %c0_i32_115 : i32
    scf.if %278 {
      %c0_116 = arith.constant 0 : index
      %c0_117 = arith.constant 0 : index
      %279 = vector.load %arg4[%c0_116, %c0_117] : memref<8x128xf32, #tpu.memory_space<vmem>>, vector<8x128xf32>
      %c0_118 = arith.constant 0 : index
      %c0_119 = arith.constant 0 : index
      %280 = vector.load %arg3[%c0_118, %c0_119] : memref<8x128xf32, #tpu.memory_space<vmem>>, vector<8x128xf32>
      tpu.vector_store %arg3[%c0_118, %c0_119], %279 {strides = array<i32>} : memref<8x128xf32, #tpu.memory_space<vmem>>, vector<8x128xf32>,
    } else {
    }
    return
  }
  func.func @transform_0(%arg0: i32) -> (i32, i32, i32) {
    %c0_i32 = arith.constant 0 : i32
    %c0_i32_0 = arith.constant 0 : i32
    %c0_i32_1 = arith.constant 0 : i32
    return %arg0, %c0_i32, %c0_i32_0 : i32, i32, i32
  }
  func.func @transform_1(%arg0: i32) -> (i32, i32) {
    %c0_i32 = arith.constant 0 : i32
    %c0_i32_0 = arith.constant 0 : i32
    %c0_i32_1 = arith.constant 0 : i32
    return %c0_i32, %c0_i32_0 : i32, i32
  }
  func.func @transform_2(%arg0: i32) -> (i32, i32) {
    %c0_i32 = arith.constant 0 : i32
    %c0_i32_0 = arith.constant 0 : i32
    %c0_i32_1 = arith.constant 0 : i32
    return %c0_i32, %c0_i32_0 : i32, i32
  }
}

</mosaic_0001>

<bundles_post_ra>
// kernel: tpu_custom_call.1
= control target key start
LH: loop header
LB: loop body
LE: loop exit
PB: predicated region body
PF: predicated region fallthrough
CT: control target
= control target key end

     0   :  { %7 = vsyncpa [#allocation5], 0  ;;  %s2723_s0 = inlined_call_operand.hbm [shape: f32[8,8,512], index: 0, kind: input, shape index: {}]   ;;  %s2724_s1 = inlined_call_operand.hbm [shape: f32[128,512], index: 1, kind: input, shape index: {}]   ;;  %s2725_s2 = inlined_call_operand.hbm [shape: f32[8,128], index: 2, kind: output, shape index: {}]  }
   0x1   :  { %8 = vsyncpa [#allocation8], 0 }
   0x2   :  { %9 = vsyncpa [#allocation6], 0  ;;  %s2304_s9 = smov [#allocation4]   ;;  %s2232_s13 = scalar_lea.hbm %s2723_s0, 4096 }
   0x3   :  { %s15_s10 = sshll.u32 %s2304_s9, 4  ;;  %p2233_p0 = scmp.ne.s32.totalorder %s2723_s0, %s2232_s13  ;;  %s16_s10 = int_to_ptr.vmem [resolvable:$true] %s15_s10 }
   0x4   :  { %p2236_p1 = scmp.lt.u32.totalorder %s2232_s13, %s2723_s0 }
   0x6   :  { %p2238_p2 = pnand %p2236_p1, %p2233_p0 }
   0x8   :  { %2241 = shalt.err (!%p2238_p2)
}
   0x9   :  { %s2242_s18 = scalar_lea.vmem %s16_s10, 4096  ;;  %p2247_p4 = scmp.lt.s32.totalorder %s16_s10, %s16_s10 }
   0xa   :  { %p2243_p3 = scmp.ne.s32.totalorder %s16_s10, %s2242_s18  ;;  %p2248_p5 = scmp.lt.s32.totalorder %s2242_s18, %s2242_s18 }
   0xc   :  { %p2249_p6 = por %p2248_p5, %p2247_p4 }
   0xe   :  { %p2250_p7 = pnand %p2249_p6, %p2243_p3 }
  0x10   :  { %2253 = shalt.err (!%p2250_p7)
}
  0x11   :  { %s2305_s19 = smov 512   ;;  %s2306_s20 = smov 32  }
  0x12   :  { %21 = dma.hbm_to_vmem [thread:$0]  %s2723_s0, 4096, %s16_s10, [#allocation5], %s2305_s19, %s2305_s19, %s2306_s20  }
  0x13   :  { %s2307_s23 = smov [#allocation7]   ;;  %s2254_s27 = scalar_lea.hbm %s2724_s1, 8192 }
  0x14   :  { %s27_s24 = sshll.u32 %s2307_s23, 4  ;;  %p2255_p8 = scmp.ne.s32.totalorder %s2724_s1, %s2254_s27  ;;  %s28_s24 = int_to_ptr.vmem [resolvable:$true] %s27_s24 }
  0x15   :  { %p2258_p9 = scmp.lt.u32.totalorder %s2254_s27, %s2724_s1 }
  0x17   :  { %p2260_p10 = pnand %p2258_p9, %p2255_p8 }
  0x19   :  { %2263 = shalt.err (!%p2260_p10)
}
  0x1a   :  { %s2264_s4 = scalar_lea.vmem %s28_s24, 8192  ;;  %p2269_p12 = scmp.lt.s32.totalorder %s28_s24, %s28_s24 }
  0x1b   :  { %p2265_p11 = scmp.ne.s32.totalorder %s28_s24, %s2264_s4  ;;  %p2270_p13 = scmp.lt.s32.totalorder %s2264_s4, %s2264_s4 }
  0x1d   :  { %p2271_p0 = por %p2270_p13, %p2269_p12 }
  0x1f   :  { %p2272_p1 = pnand %p2271_p0, %p2265_p11 }
  0x21   :  { %2275 = shalt.err (!%p2272_p1)
}
  0x22   :  { %33 = dma.hbm_to_vmem [thread:$0]  %s2724_s1, 8192, %s28_s24, [#allocation8], %s2305_s19, %s2305_s19, %s2306_s20  }
  0x23   :  { %2298 = dma.done.wait [#allocation5], 4096  }
  0x24   :  { %2299 = vsyncadd [#allocation5], 4294963200 }
  0x25   :  { %2300 = dma.done.wait [#allocation8], 8192  }
  0x26   :  { %2301 = vsyncadd [#allocation8], 4294959104  ;;  %v2308_v0 = vmov 0.0   ;;  %v47_v1 = vld [vmem:[#allocation7 + $0x8] sm:$0xff]  ;;  %v46_v3 = vld [vmem:[#allocation7] sm:$0xff]  ;;  %s2309_s1 = smov [#allocation9]  }
  0x27   :  { %180 = vmatprep.mubr.f32.mxu0 %v2308_v0  ;;  %251 = vmatprep.mubr.f32.mxu1 %v2308_v0  ;;  %v51_v2 = vld [vmem:[#allocation7 + $0x28] sm:$0xff]  ;;  %v50_v5 = vld [vmem:[#allocation7 + $0x20] sm:$0xff]  ;;  %v49_v19 = vld [vmem:[#allocation7 + $0x18] sm:$0xff]  ;;  %s1552_s6 = sshll.u32 %s2309_s1, 4  ;;  %s1553_s6 = int_to_ptr.vmem [resolvable:$true] %s1552_s6 }
  0x28   :  { %v2351_v4 = vpack.c.bf16 %v51_v2, %v47_v1  ;;  %v55_v6 = vld [vmem:[#allocation7 + $0x48] sm:$0xff]  ;;  %v2353_v8 = vpack.c.bf16 %v50_v5, %v46_v3  ;;  %v54_v10 = vld [vmem:[#allocation7 + $0x40] sm:$0xff]  ;;  %v53_v20 = vld [vmem:[#allocation7 + $0x38] sm:$0xff]  ;;  %s2276_s7 = scalar_lea.vmem %s1553_s6, 128  ;;  %p2281_p3 = scmp.lt.s32.totalorder %s1553_s6, %s1553_s6 }
  0x29   :  { %v59_v7 = vld [vmem:[#allocation7 + $0x68] sm:$0xff]  ;;  %v58_v11 = vld [vmem:[#allocation7 + $0x60] sm:$0xff]  ;;  %v2364_v22 = vpack.c.bf16 %v53_v20, %v49_v19  ;;  %v48_v23 = vld [vmem:[#allocation7 + $0x10] sm:$0xff]  ;;  %p2277_p2 = scmp.ne.s32.totalorder %s1553_s6, %s2276_s7  ;;  %p2282_p4 = scmp.lt.s32.totalorder %s2276_s7, %s2276_s7 }
  0x2a   :  { %v2355_v9 = vpack.c.bf16 %v59_v7, %v55_v6  ;;  %v63_v12 = vld [vmem:[#allocation7 + $0x88] sm:$0xff]  ;;  %1587 = vmatprep.subr.bf16.mxu0 %v2351_v4  ;;  %v2359_v14 = vpack.c.bf16 %v58_v11, %v54_v10  ;;  %v62_v15 = vld [vmem:[#allocation7 + $0x80] sm:$0xff]  ;;  %v52_v24 = vld [vmem:[#allocation7 + $0x30] sm:$0xff] }
  0x2b   :  { %v67_v13 = vld [vmem:[#allocation7 + $0xa8] sm:$0xff]  ;;  %1589 = vmatpush1.bf16.msra.mxu0 %v2353_v8  ;;  %v66_v16 = vld [vmem:[#allocation7 + $0xa0] sm:$0xff]  ;;  %v2366_v25 = vpack.c.bf16 %v52_v24, %v48_v23  ;;  %1619 = vmatprep.subr.bf16.mxu1 %v2364_v22  ;;  %v57_v27 = vld [vmem:[#allocation7 + $0x58] sm:$0xff]  ;;  %p2283_p5 = por %p2282_p4, %p2281_p3 }
  0x2c   :  { %1591 = vmatprep.subr.bf16.mxu0 %v2355_v9  ;;  %v2362_v17 = vpack.c.bf16 %v67_v13, %v63_v12  ;;  %v71_v18 = vld [vmem:[#allocation7 + $0xc8] sm:$0xff]  ;;  %v2369_v26 = vpack.c.bf16 %v66_v16, %v62_v15  ;;  %v61_v28 = vld [vmem:[#allocation7 + $0x78] sm:$0xff]  ;;  %v56_v29 = vld [vmem:[#allocation7 + $0x50] sm:$0xff] }
  0x2d   :  { %v75_v21 = vld [vmem:[#allocation7 + $0xe8] sm:$0xff]  ;;  %v70_v31 = vld [vmem:[#allocation7 + $0xc0] sm:$0xff]  ;;  %1621 = vmatpush1.bf16.msra.mxu1 %v2366_v25  ;;  %v2376_v33 = vpack.c.bf16 %v61_v28, %v57_v27  ;;  %v60_v34 = vld [vmem:[#allocation7 + $0x70] sm:$0xff]  ;;  %p2284_p6 = pnand %p2283_p5, %p2277_p2 }
  0x2e   :  { %v2373_v30 = vpack.c.bf16 %v75_v21, %v71_v18  ;;  %v74_v32 = vld [vmem:[#allocation7 + $0xe0] sm:$0xff]  ;;  %v79_v35 = vld [vmem:[#allocation7 + $0x108] sm:$0xff]  ;;  %v2378_v37 = vpack.c.bf16 %v60_v34, %v56_v29  ;;  %v65_v38 = vld [vmem:[#allocation7 + $0x98] sm:$0xff] }
  0x2f   :  { %1593 = vmatpush1.bf16.msra.mxu0 %v2359_v14  ;;  %v83_v36 = vld [vmem:[#allocation7 + $0x128] sm:$0xff]  ;;  %1623 = vmatprep.subr.bf16.mxu1 %v2376_v33  ;;  %v69_v39 = vld [vmem:[#allocation7 + $0xb8] sm:$0xff]  ;;  %v64_v40 = vld [vmem:[#allocation7 + $0x90] sm:$0xff]  ;;  %v2382_v42 = vpack.c.bf16 %v74_v32, %v70_v31 }
  0x30   :  { %1595 = vmatprep.subr.bf16.mxu0 %v2362_v17  ;;  %v68_v41 = vld [vmem:[#allocation7 + $0xb0] sm:$0xff]  ;;  %v78_v43 = vld [vmem:[#allocation7 + $0x100] sm:$0xff]  ;;  %v2384_v45 = vpack.c.bf16 %v69_v39, %v65_v38  ;;  %v2387_v46 = vpack.c.bf16 %v83_v36, %v79_v35  ;;  %v87_v47 = vld [vmem:[#allocation7 + $0x148] sm:$0xff] }
  0x31   :  { %v82_v44 = vld [vmem:[#allocation7 + $0x120] sm:$0xff]  ;;  %1625 = vmatpush1.bf16.msra.mxu1 %v2378_v37  ;;  %v2390_v48 = vpack.c.bf16 %v68_v41, %v64_v40  ;;  %v73_v49 = vld [vmem:[#allocation7 + $0xd8] sm:$0xff]  ;;  %v91_v51 = vld [vmem:[#allocation7 + $0x168] sm:$0xff] }
  0x32   :  { %v77_v50 = vld [vmem:[#allocation7 + $0xf8] sm:$0xff]  ;;  %1627 = vmatprep.subr.bf16.mxu1 %v2384_v45  ;;  %v72_v53 = vld [vmem:[#allocation7 + $0xd0] sm:$0xff]  ;;  %v2396_v55 = vpack.c.bf16 %v82_v44, %v78_v43  ;;  %v2399_v58 = vpack.c.bf16 %v91_v51, %v87_v47  ;;  %v86_v59 = vld [vmem:[#allocation7 + $0x140] sm:$0xff] }
  0x33   :  { %1597 = vmatpush1.bf16.msra.mxu0 %v2369_v26  ;;  %v2393_v52 = vpack.c.bf16 %v77_v50, %v73_v49  ;;  %v76_v54 = vld [vmem:[#allocation7 + $0xf0] sm:$0xff]  ;;  %v81_v56 = vld [vmem:[#allocation7 + $0x118] sm:$0xff]  ;;  %v90_v60 = vld [vmem:[#allocation7 + $0x160] sm:$0xff] }
  0x34   :  { %1599 = vmatprep.subr.bf16.mxu0 %v2373_v30  ;;  %v85_v57 = vld [vmem:[#allocation7 + $0x138] sm:$0xff]  ;;  %v95_v61 = vld [vmem:[#allocation7 + $0x188] sm:$0xff]  ;;  %v2402_v62 = vpack.c.bf16 %v76_v54, %v72_v53  ;;  %v80_v2 = vld [vmem:[#allocation7 + $0x110] sm:$0xff]  ;;  %v2408_v7 = vpack.c.bf16 %v90_v60, %v86_v59 }
  0x35   :  { %1629 = vmatpush1.bf16.msra.mxu1 %v2390_v48  ;;  %v99_v63 = vld [vmem:[#allocation7 + $0x1a8] sm:$0xff]  ;;  %v2405_v1 = vpack.c.bf16 %v85_v57, %v81_v56  ;;  %v84_v3 = vld [vmem:[#allocation7 + $0x130] sm:$0xff]  ;;  %v89_v5 = vld [vmem:[#allocation7 + $0x158] sm:$0xff] }
  0x36   :  { %1631 = vmatprep.subr.bf16.mxu1 %v2393_v52  ;;  %v93_v6 = vld [vmem:[#allocation7 + $0x178] sm:$0xff]  ;;  %v2411_v10 = vpack.c.bf16 %v99_v63, %v95_v61  ;;  %v94_v11 = vld [vmem:[#allocation7 + $0x180] sm:$0xff]  ;;  %v103_v13 = vld [vmem:[#allocation7 + $0x1c8] sm:$0xff]  ;;  %v2414_v15 = vpack.c.bf16 %v84_v3, %v80_v2 }
  0x37   :  { %1601 = vmatpush1.bf16.msra.mxu0 %v2382_v42  ;;  %v98_v12 = vld [vmem:[#allocation7 + $0x1a0] sm:$0xff]  ;;  %v107_v16 = vld [vmem:[#allocation7 + $0x1e8] sm:$0xff]  ;;  %v2417_v18 = vpack.c.bf16 %v93_v6, %v89_v5  ;;  %v88_v19 = vld [vmem:[#allocation7 + $0x150] sm:$0xff] }
  0x38   :  { %1603 = vmatprep.subr.bf16.mxu0 %v2387_v46  ;;  %v92_v20 = vld [vmem:[#allocation7 + $0x170] sm:$0xff]  ;;  %v97_v21 = vld [vmem:[#allocation7 + $0x198] sm:$0xff]  ;;  %v2420_v24 = vpack.c.bf16 %v98_v12, %v94_v11  ;;  %v2423_v27 = vpack.c.bf16 %v107_v16, %v103_v13  ;;  %v102_v28 = vld [vmem:[#allocation7 + $0x1c0] sm:$0xff] }
  0x39   :  { %1633 = vmatpush1.bf16.msra.mxu1 %v2402_v62  ;;  %v101_v23 = vld [vmem:[#allocation7 + $0x1b8] sm:$0xff]  ;;  %v106_v29 = vld [vmem:[#allocation7 + $0x1e0] sm:$0xff]  ;;  %v2426_v31 = vpack.c.bf16 %v92_v20, %v88_v19  ;;  %v96_v34 = vld [vmem:[#allocation7 + $0x190] sm:$0xff] }
  0x3a   :  { %1635 = vmatprep.subr.bf16.mxu1 %v2405_v1  ;;  %v2429_v32 = vpack.c.bf16 %v101_v23, %v97_v21  ;;  %v100_v35 = vld [vmem:[#allocation7 + $0x1b0] sm:$0xff]  ;;  %v105_v36 = vld [vmem:[#allocation7 + $0x1d8] sm:$0xff]  ;;  %v2432_v39 = vpack.c.bf16 %v106_v29, %v102_v28  ;;  %v112_v49 = vld [vmem:[#allocation4] sm:$0xff] }
  0x3b   :  { %1605 = vmatpush1.bf16.msra.mxu0 %v2396_v55  ;;  %v109_v38 = vld [vmem:[#allocation7 + $0x1f8] sm:$0xff]  ;;  %v2436_v40 = vpack.c.bf16 %v100_v35, %v96_v34  ;;  %v104_v43 = vld [vmem:[#allocation7 + $0x1d0] sm:$0xff]  ;;  %v113_v50 = vld [vmem:[#allocation4 + $0x8] sm:$0xff] }
  0x3c   :  { %1607 = vmatprep.subr.bf16.mxu0 %v2399_v58  ;;  %v2439_v41 = vpack.c.bf16 %v109_v38, %v105_v36  ;;  %v108_v44 = vld [vmem:[#allocation7 + $0x1f0] sm:$0xff]  ;;  %v115_v60 = vld [vmem:[#allocation4 + $0x18] sm:$0xff] }
  0x3d   :  { %1637 = vmatpush1.bf16.msra.mxu1 %v2414_v15  ;;  %v2443_v47 = vpack.c.bf16 %v108_v44, %v104_v43  ;;  %v114_v3 = vld [vmem:[#allocation4 + $0x10] sm:$0xff]  ;;  %v291_v44 = vld [vmem:[#allocation4 + $0x20] sm:$0xff] }
  0x3e   :  { %1639 = vmatprep.subr.bf16.mxu1 %v2417_v18 }
  0x3f   :  { %1609 = vmatpush1.bf16.msra.mxu0 %v2408_v7 }
  0x40   :  { %1611 = vmatprep.subr.bf16.mxu0 %v2411_v10 }
  0x41   :  { %1641 = vmatpush1.bf16.msra.mxu1 %v2426_v31 }
  0x42   :  { %1643 = vmatprep.subr.bf16.mxu1 %v2429_v32 }
  0x43   :  { %1613 = vmatpush1.bf16.msra.mxu0 %v2420_v24 }
  0x44   :  { %1615 = vmatprep.subr.bf16.mxu0 %v2423_v27 }
  0x45   :  { %1645 = vmatpush1.bf16.msra.mxu1 %v2436_v40 }
  0x46   :  { %1647 = vmatprep.subr.bf16.mxu1 %v2439_v41 }
  0x47   :  { %1617 = vmatpush1.bf16.msra.mxu0 %v2432_v39 }
  0x48   :  { %1651 = vmatprep.subr.bf16.mxu0 %v2351_v4 }
  0x49   :  { %1649 = vmatpush1.bf16.msra.mxu1 %v2443_v47 }
  0x4a   :  { %181 = vmatmul.mubr.f32.vlgmr.msra.gmra.mrb[0].mxu0 %v2308_v0  ;;  %1683 = vmatprep.subr.bf16.mxu1 %v2364_v22 }
  0x4b   :  { %1653 = vmatpush1.bf16.msra.mxu0 %v2353_v8  ;;  %359 = vmatprep.mubr.f32.mxu0 %v2308_v0 }
  0x4c   :  { %1655 = vmatprep.subr.bf16.mxu0 %v2355_v9  ;;  %252 = vmatmul.mubr.f32.vlgmr.msra.gmra.mrb[0].mxu1 %v2308_v0 }
  0x4d   :  { %1685 = vmatpush1.bf16.msra.mxu1 %v2366_v25  ;;  %430 = vmatprep.mubr.f32.mxu1 %v2308_v0 }
  0x4e   :  { %1687 = vmatprep.subr.bf16.mxu1 %v2376_v33 }
  0x4f   :  { %1657 = vmatpush1.bf16.msra.mxu0 %v2359_v14 }
  0x50   :  { %1659 = vmatprep.subr.bf16.mxu0 %v2362_v17 }
  0x51   :  { %1689 = vmatpush1.bf16.msra.mxu1 %v2378_v37 }
  0x52   :  { %1691 = vmatprep.subr.bf16.mxu1 %v2384_v45 }
  0x53   :  { %1661 = vmatpush1.bf16.msra.mxu0 %v2369_v26 }
  0x54   :  { %1663 = vmatprep.subr.bf16.mxu0 %v2373_v30 }
  0x55   :  { %1693 = vmatpush1.bf16.msra.mxu1 %v2390_v48 }
  0x56   :  { %1695 = vmatprep.subr.bf16.mxu1 %v2393_v52 }
  0x57   :  { %1665 = vmatpush1.bf16.msra.mxu0 %v2382_v42 }
  0x58   :  { %1667 = vmatprep.subr.bf16.mxu0 %v2387_v46 }
  0x59   :  { %1697 = vmatpush1.bf16.msra.mxu1 %v2402_v62 }
  0x5a   :  { %1699 = vmatprep.subr.bf16.mxu1 %v2405_v1 }
  0x5b   :  { %1669 = vmatpush1.bf16.msra.mxu0 %v2396_v55 }
  0x5c   :  { %1671 = vmatprep.subr.bf16.mxu0 %v2399_v58 }
  0x5d   :  { %1701 = vmatpush1.bf16.msra.mxu1 %v2414_v15 }
  0x5e   :  { %1703 = vmatprep.subr.bf16.mxu1 %v2417_v18 }
  0x5f   :  { %1673 = vmatpush1.bf16.msra.mxu0 %v2408_v7 }
  0x60   :  { %1675 = vmatprep.subr.bf16.mxu0 %v2411_v10 }
  0x61   :  { %1705 = vmatpush1.bf16.msra.mxu1 %v2426_v31 }
  0x62   :  { %1707 = vmatprep.subr.bf16.mxu1 %v2429_v32 }
  0x63   :  { %1677 = vmatpush1.bf16.msra.mxu0 %v2420_v24 }
  0x64   :  { %1679 = vmatprep.subr.bf16.mxu0 %v2423_v27 }
  0x65   :  { %1709 = vmatpush1.bf16.msra.mxu1 %v2436_v40 }
  0x66   :  { %1711 = vmatprep.subr.bf16.mxu1 %v2439_v41 }
  0x67   :  { %1681 = vmatpush1.bf16.msra.mxu0 %v2432_v39 }
  0x68   :  { %1715 = vmatprep.subr.bf16.mxu0 %v2351_v4 }
  0x69   :  { %1713 = vmatpush1.bf16.msra.mxu1 %v2443_v47 }
  0x6a   :  { %1747 = vmatprep.subr.bf16.mxu1 %v2364_v22 }
 0x11d   :  { %v182_v51 = vpop.f32.mrb[0].mxu0 }
 0x11e   :  { %v258_v53 = vadd.f32 %v182_v51, %v112_v49  ;;  %v184_v54 = vpop.f32.mrb[1].mxu0  ;;  %v292_v49 = vld [vmem:[#allocation4 + $0x28] sm:$0xff] }
 0x11f   :  { %v259_v56 = vadd.f32 %v184_v54, %v113_v50  ;;  %v253_v61 = vpop.f32.mrb[0].mxu1 }
 0x120   :  { %v1562_v57 = vmul.f32 -1.442695, %v258_v53  ;;  %v255_v63 = vpop.f32.mrb[1].mxu1  ;;  %v260_v6 = vadd.f32 %v253_v61, %v114_v3  ;;  %v294_v61 = vld [vmem:[#allocation4 + $0x38] sm:$0xff] }
 0x121   :  { %v1563_v59 = vmul.f32 -1.442695, %v259_v56  ;;  %v261_v2 = vadd.f32 %v255_v63, %v115_v60 }
 0x122   :  { %2104 = vpow2.f32 %v1562_v57 }
 0x123   :  { %2106 = vpow2.f32 %v1563_v59  ;;  %v1564_v5 = vmul.f32 -1.442695, %v261_v2  ;;  %v293_v2 = vld [vmem:[#allocation4 + $0x30] sm:$0xff] }
 0x125   :  { %2108 = vpow2.f32 %v1564_v5 }
 0x126   :  { %2110 = vtanh.f32 %v260_v6 }
 0x12c   :  { %v2105_v11 = vpop.eup %2104 }
 0x12d   :  { %v2107_v12 = vpop.eup %2106  ;;  %v265_v13 = vadd.f32 1.0, %v2105_v11 }
 0x12e   :  { %v271_v16 = vadd.f32 1.0, %v2107_v12 }
 0x12f   :  { %2112 = vrcp.f32 %v265_v13  ;;  %v2109_v19 = vpop.eup %2108 }
 0x130   :  { %2114 = vrcp.f32 %v271_v16  ;;  %v2111_v20 = vpop.eup %2110  ;;  %v278_v23 = vadd.f32 1.0, %v2109_v19 }
 0x132   :  { %2116 = vrcp.f32 %v278_v23 }
 0x139   :  { %v2113_v21 = vpop.eup %2112 }
 0x13a   :  { %v2115_v28 = vpop.eup %2114  ;;  %v282_v29 = vmul.f32 %v2113_v21, %v2111_v20 }
 0x13b   :  { %v281_v34 = vmul.f32 0.0, %v2115_v28 }
 0x13c   :  { %v2117_v36 = vpop.eup %2116 }
 0x13d   :  { %v2485_v35 = vadd.f32 %v282_v29, %v281_v34 }
 0x13f   :  { %2118 = vtanh.f32 %v2485_v35 }
 0x149   :  { %v2119_v38 = vpop.eup %2118 }
 0x14a   :  { %v285_v43 = vmul.f32 %v2119_v38, %v2117_v36 }
 0x14c   :  { %360 = vmatmul.mubr.f32.vlgmr.msra.gmra.mrb[2].mxu0 %v285_v43  ;;  %431 = vmatmul.mubr.f32.vlgmr.msra.gmra.mrb[2].mxu1 %v285_v43 }
 0x14d   :  { %1717 = vmatpush1.bf16.msra.mxu0 %v2353_v8  ;;  %1749 = vmatpush1.bf16.msra.mxu1 %v2366_v25 }
 0x14e   :  { %1719 = vmatprep.subr.bf16.mxu0 %v2355_v9  ;;  %1751 = vmatprep.subr.bf16.mxu1 %v2376_v33 }
 0x14f   :  { %538 = vmatprep.mubr.f32.mxu0 %v2308_v0  ;;  %609 = vmatprep.mubr.f32.mxu1 %v2308_v0 }
 0x151   :  { %1721 = vmatpush1.bf16.msra.mxu0 %v2359_v14  ;;  %1753 = vmatpush1.bf16.msra.mxu1 %v2378_v37 }
 0x152   :  { %1723 = vmatprep.subr.bf16.mxu0 %v2362_v17  ;;  %1755 = vmatprep.subr.bf16.mxu1 %v2384_v45 }
 0x155   :  { %1725 = vmatpush1.bf16.msra.mxu0 %v2369_v26  ;;  %1757 = vmatpush1.bf16.msra.mxu1 %v2390_v48 }
 0x156   :  { %1727 = vmatprep.subr.bf16.mxu0 %v2373_v30  ;;  %1759 = vmatprep.subr.bf16.mxu1 %v2393_v52 }
 0x159   :  { %1729 = vmatpush1.bf16.msra.mxu0 %v2382_v42  ;;  %1761 = vmatpush1.bf16.msra.mxu1 %v2402_v62 }
 0x15a   :  { %1731 = vmatprep.subr.bf16.mxu0 %v2387_v46  ;;  %1763 = vmatprep.subr.bf16.mxu1 %v2405_v1 }
 0x15d   :  { %1733 = vmatpush1.bf16.msra.mxu0 %v2396_v55  ;;  %1765 = vmatpush1.bf16.msra.mxu1 %v2414_v15 }
 0x15e   :  { %1735 = vmatprep.subr.bf16.mxu0 %v2399_v58  ;;  %1767 = vmatprep.subr.bf16.mxu1 %v2417_v18 }
 0x161   :  { %1737 = vmatpush1.bf16.msra.mxu0 %v2408_v7  ;;  %1769 = vmatpush1.bf16.msra.mxu1 %v2426_v31 }
 0x162   :  { %1739 = vmatprep.subr.bf16.mxu0 %v2411_v10  ;;  %1771 = vmatprep.subr.bf16.mxu1 %v2429_v32 }
 0x165   :  { %1741 = vmatpush1.bf16.msra.mxu0 %v2420_v24  ;;  %1773 = vmatpush1.bf16.msra.mxu1 %v2436_v40 }
 0x166   :  { %1743 = vmatprep.subr.bf16.mxu0 %v2423_v27  ;;  %1775 = vmatprep.subr.bf16.mxu1 %v2439_v41 }
 0x169   :  { %1745 = vmatpush1.bf16.msra.mxu0 %v2432_v39  ;;  %1777 = vmatpush1.bf16.msra.mxu1 %v2443_v47 }
 0x16a   :  { %1779 = vmatprep.subr.bf16.mxu0 %v2351_v4  ;;  %1811 = vmatprep.subr.bf16.mxu1 %v2364_v22 }
 0x21f   :  { %v361_v50 = vpop.f32.mrb[2].mxu0  ;;  %v432_v51 = vpop.f32.mrb[2].mxu1 }
 0x220   :  { %v437_v53 = vadd.f32 %v361_v50, %v291_v44  ;;  %v363_v54 = vpop.f32.mrb[3].mxu0  ;;  %v434_v56 = vpop.f32.mrb[3].mxu1  ;;  %v439_v5 = vadd.f32 %v432_v51, %v293_v2  ;;  %v471_v44 = vld [vmem:[#allocation4 + $0x48] sm:$0xff] }
 0x221   :  { %v438_v57 = vadd.f32 %v363_v54, %v292_v49  ;;  %v440_v63 = vadd.f32 %v434_v56, %v294_v61 }
 0x222   :  { %v1565_v59 = vmul.f32 -1.442695, %v437_v53 }
 0x223   :  { %v1566_v60 = vmul.f32 -1.442695, %v438_v57  ;;  %v1567_v3 = vmul.f32 -1.442695, %v440_v63  ;;  %v472_v63 = vld [vmem:[#allocation4 + $0x50] sm:$0xff] }
 0x224   :  { %2120 = vpow2.f32 %v1565_v59 }
 0x225   :  { %2122 = vpow2.f32 %v1566_v60  ;;  %v473_v60 = vld [vmem:[#allocation4 + $0x58] sm:$0xff] }
 0x226   :  { %2124 = vpow2.f32 %v1567_v3 }
 0x227   :  { %2126 = vtanh.f32 %v439_v5 }
 0x22e   :  { %v2121_v6 = vpop.eup %2120 }
 0x22f   :  { %v2123_v11 = vpop.eup %2122  ;;  %v444_v12 = vadd.f32 1.0, %v2121_v6 }
 0x230   :  { %v450_v13 = vadd.f32 1.0, %v2123_v11  ;;  %v2125_v16 = vpop.eup %2124 }
 0x231   :  { %2128 = vrcp.f32 %v444_v12  ;;  %v2127_v19 = vpop.eup %2126  ;;  %v457_v28 = vadd.f32 1.0, %v2125_v16 }
 0x232   :  { %2130 = vrcp.f32 %v450_v13 }
 0x233   :  { %2132 = vrcp.f32 %v457_v28 }
 0x23b   :  { %v2129_v20 = vpop.eup %2128 }
 0x23c   :  { %v2131_v21 = vpop.eup %2130  ;;  %v461_v23 = vmul.f32 %v2129_v20, %v2127_v19 }
 0x23d   :  { %v460_v29 = vmul.f32 %v2131_v21, %v2485_v35  ;;  %v2133_v36 = vpop.eup %2132  ;;  %v470_v35 = vld [vmem:[#allocation4 + $0x40] sm:$0xff] }
 0x23f   :  { %v2523_v34 = vadd.f32 %v461_v23, %v460_v29 }
 0x241   :  { %2134 = vtanh.f32 %v2523_v34 }
 0x24b   :  { %v2135_v38 = vpop.eup %2134 }
 0x24c   :  { %v464_v43 = vmul.f32 %v2135_v38, %v2133_v36 }
 0x24e   :  { %539 = vmatmul.mubr.f32.vlgmr.msra.gmra.mrb[4].mxu0 %v464_v43  ;;  %610 = vmatmul.mubr.f32.vlgmr.msra.gmra.mrb[4].mxu1 %v464_v43 }
 0x24f   :  { %1781 = vmatpush1.bf16.msra.mxu0 %v2353_v8  ;;  %1813 = vmatpush1.bf16.msra.mxu1 %v2366_v25 }
 0x250   :  { %1783 = vmatprep.subr.bf16.mxu0 %v2355_v9  ;;  %1815 = vmatprep.subr.bf16.mxu1 %v2376_v33 }
 0x251   :  { %717 = vmatprep.mubr.f32.mxu0 %v2308_v0  ;;  %788 = vmatprep.mubr.f32.mxu1 %v2308_v0 }
 0x253   :  { %1785 = vmatpush1.bf16.msra.mxu0 %v2359_v14  ;;  %1817 = vmatpush1.bf16.msra.mxu1 %v2378_v37 }
 0x254   :  { %1787 = vmatprep.subr.bf16.mxu0 %v2362_v17  ;;  %1819 = vmatprep.subr.bf16.mxu1 %v2384_v45 }
 0x257   :  { %1789 = vmatpush1.bf16.msra.mxu0 %v2369_v26  ;;  %1821 = vmatpush1.bf16.msra.mxu1 %v2390_v48 }
 0x258   :  { %1791 = vmatprep.subr.bf16.mxu0 %v2373_v30  ;;  %1823 = vmatprep.subr.bf16.mxu1 %v2393_v52 }
 0x25b   :  { %1793 = vmatpush1.bf16.msra.mxu0 %v2382_v42  ;;  %1825 = vmatpush1.bf16.msra.mxu1 %v2402_v62 }
 0x25c   :  { %1795 = vmatprep.subr.bf16.mxu0 %v2387_v46  ;;  %1827 = vmatprep.subr.bf16.mxu1 %v2405_v1 }
 0x25f   :  { %1797 = vmatpush1.bf16.msra.mxu0 %v2396_v55  ;;  %1829 = vmatpush1.bf16.msra.mxu1 %v2414_v15 }
 0x260   :  { %1799 = vmatprep.subr.bf16.mxu0 %v2399_v58  ;;  %1831 = vmatprep.subr.bf16.mxu1 %v2417_v18 }
 0x263   :  { %1801 = vmatpush1.bf16.msra.mxu0 %v2408_v7  ;;  %1833 = vmatpush1.bf16.msra.mxu1 %v2426_v31 }
 0x264   :  { %1803 = vmatprep.subr.bf16.mxu0 %v2411_v10  ;;  %1835 = vmatprep.subr.bf16.mxu1 %v2429_v32 }
 0x267   :  { %1805 = vmatpush1.bf16.msra.mxu0 %v2420_v24  ;;  %1837 = vmatpush1.bf16.msra.mxu1 %v2436_v40 }
 0x268   :  { %1807 = vmatprep.subr.bf16.mxu0 %v2423_v27  ;;  %1839 = vmatprep.subr.bf16.mxu1 %v2439_v41 }
 0x26b   :  { %1809 = vmatpush1.bf16.msra.mxu0 %v2432_v39  ;;  %1841 = vmatpush1.bf16.msra.mxu1 %v2443_v47 }
 0x26c   :  { %1843 = vmatprep.subr.bf16.mxu0 %v2351_v4  ;;  %1875 = vmatprep.subr.bf16.mxu1 %v2364_v22 }
 0x321   :  { %v540_v49 = vpop.f32.mrb[4].mxu0  ;;  %v611_v50 = vpop.f32.mrb[4].mxu1 }
 0x322   :  { %v616_v51 = vadd.f32 %v540_v49, %v470_v35  ;;  %v542_v53 = vpop.f32.mrb[5].mxu0  ;;  %v613_v54 = vpop.f32.mrb[5].mxu1  ;;  %v618_v3 = vadd.f32 %v611_v50, %v472_v63  ;;  %v650_v35 = vld [vmem:[#allocation4 + $0x68] sm:$0xff] }
 0x323   :  { %v617_v56 = vadd.f32 %v542_v53, %v471_v44  ;;  %v619_v61 = vadd.f32 %v613_v54, %v473_v60 }
 0x324   :  { %v1568_v57 = vmul.f32 -1.442695, %v616_v51 }
 0x325   :  { %v1569_v59 = vmul.f32 -1.442695, %v617_v56  ;;  %v1570_v2 = vmul.f32 -1.442695, %v619_v61  ;;  %v651_v61 = vld [vmem:[#allocation4 + $0x70] sm:$0xff] }
 0x326   :  { %2136 = vpow2.f32 %v1568_v57 }
 0x327   :  { %2138 = vpow2.f32 %v1569_v59  ;;  %v652_v59 = vld [vmem:[#allocation4 + $0x78] sm:$0xff] }
 0x328   :  { %2140 = vpow2.f32 %v1570_v2 }
 0x329   :  { %2142 = vtanh.f32 %v618_v3 }
 0x330   :  { %v2137_v5 = vpop.eup %2136 }
 0x331   :  { %v2139_v6 = vpop.eup %2138  ;;  %v623_v11 = vadd.f32 1.0, %v2137_v5 }
 0x332   :  { %v629_v12 = vadd.f32 1.0, %v2139_v6  ;;  %v2141_v13 = vpop.eup %2140 }
 0x333   :  { %2144 = vrcp.f32 %v623_v11  ;;  %v2143_v16 = vpop.eup %2142  ;;  %v636_v23 = vadd.f32 1.0, %v2141_v13 }
 0x334   :  { %2146 = vrcp.f32 %v629_v12 }
 0x335   :  { %2148 = vrcp.f32 %v636_v23 }
 0x33d   :  { %v2145_v19 = vpop.eup %2144 }
 0x33e   :  { %v2147_v20 = vpop.eup %2146  ;;  %v640_v21 = vmul.f32 %v2145_v19, %v2143_v16 }
 0x33f   :  { %v639_v28 = vmul.f32 %v2147_v20, %v2523_v34  ;;  %v2149_v36 = vpop.eup %2148  ;;  %v649_v34 = vld [vmem:[#allocation4 + $0x60] sm:$0xff] }
 0x341   :  { %v2561_v29 = vadd.f32 %v640_v21, %v639_v28 }
 0x343   :  { %2150 = vtanh.f32 %v2561_v29 }
 0x34d   :  { %v2151_v38 = vpop.eup %2150 }
 0x34e   :  { %v643_v43 = vmul.f32 %v2151_v38, %v2149_v36 }
 0x350   :  { %718 = vmatmul.mubr.f32.vlgmr.msra.gmra.mrb[6].mxu0 %v643_v43  ;;  %789 = vmatmul.mubr.f32.vlgmr.msra.gmra.mrb[6].mxu1 %v643_v43 }
 0x351   :  { %1845 = vmatpush1.bf16.msra.mxu0 %v2353_v8  ;;  %1877 = vmatpush1.bf16.msra.mxu1 %v2366_v25 }
 0x352   :  { %1847 = vmatprep.subr.bf16.mxu0 %v2355_v9  ;;  %1879 = vmatprep.subr.bf16.mxu1 %v2376_v33 }
 0x353   :  { %896 = vmatprep.mubr.f32.mxu0 %v2308_v0  ;;  %967 = vmatprep.mubr.f32.mxu1 %v2308_v0 }
 0x355   :  { %1849 = vmatpush1.bf16.msra.mxu0 %v2359_v14  ;;  %1881 = vmatpush1.bf16.msra.mxu1 %v2378_v37 }
 0x356   :  { %1851 = vmatprep.subr.bf16.mxu0 %v2362_v17  ;;  %1883 = vmatprep.subr.bf16.mxu1 %v2384_v45 }
 0x359   :  { %1853 = vmatpush1.bf16.msra.mxu0 %v2369_v26  ;;  %1885 = vmatpush1.bf16.msra.mxu1 %v2390_v48 }
 0x35a   :  { %1855 = vmatprep.subr.bf16.mxu0 %v2373_v30  ;;  %1887 = vmatprep.subr.bf16.mxu1 %v2393_v52 }
 0x35d   :  { %1857 = vmatpush1.bf16.msra.mxu0 %v2382_v42  ;;  %1889 = vmatpush1.bf16.msra.mxu1 %v2402_v62 }
 0x35e   :  { %1859 = vmatprep.subr.bf16.mxu0 %v2387_v46  ;;  %1891 = vmatprep.subr.bf16.mxu1 %v2405_v1 }
 0x361   :  { %1861 = vmatpush1.bf16.msra.mxu0 %v2396_v55  ;;  %1893 = vmatpush1.bf16.msra.mxu1 %v2414_v15 }
 0x362   :  { %1863 = vmatprep.subr.bf16.mxu0 %v2399_v58  ;;  %1895 = vmatprep.subr.bf16.mxu1 %v2417_v18 }
 0x365   :  { %1865 = vmatpush1.bf16.msra.mxu0 %v2408_v7  ;;  %1897 = vmatpush1.bf16.msra.mxu1 %v2426_v31 }
 0x366   :  { %1867 = vmatprep.subr.bf16.mxu0 %v2411_v10  ;;  %1899 = vmatprep.subr.bf16.mxu1 %v2429_v32 }
 0x369   :  { %1869 = vmatpush1.bf16.msra.mxu0 %v2420_v24  ;;  %1901 = vmatpush1.bf16.msra.mxu1 %v2436_v40 }
 0x36a   :  { %1871 = vmatprep.subr.bf16.mxu0 %v2423_v27  ;;  %1903 = vmatprep.subr.bf16.mxu1 %v2439_v41 }
 0x36d   :  { %1873 = vmatpush1.bf16.msra.mxu0 %v2432_v39  ;;  %1905 = vmatpush1.bf16.msra.mxu1 %v2443_v47 }
 0x36e   :  { %1907 = vmatprep.subr.bf16.mxu0 %v2351_v4  ;;  %1939 = vmatprep.subr.bf16.mxu1 %v2364_v22 }
 0x423   :  { %v719_v44 = vpop.f32.mrb[6].mxu0  ;;  %v790_v49 = vpop.f32.mrb[6].mxu1 }
 0x424   :  { %v795_v50 = vadd.f32 %v719_v44, %v649_v34  ;;  %v721_v51 = vpop.f32.mrb[7].mxu0  ;;  %v792_v53 = vpop.f32.mrb[7].mxu1  ;;  %v797_v2 = vadd.f32 %v790_v49, %v651_v61  ;;  %v829_v34 = vld [vmem:[#allocation4 + $0x88] sm:$0xff] }
 0x425   :  { %v796_v54 = vadd.f32 %v721_v51, %v650_v35  ;;  %v798_v60 = vadd.f32 %v792_v53, %v652_v59 }
 0x426   :  { %v1571_v56 = vmul.f32 -1.442695, %v795_v50 }
 0x427   :  { %v1572_v57 = vmul.f32 -1.442695, %v796_v54  ;;  %v1573_v63 = vmul.f32 -1.442695, %v798_v60  ;;  %v830_v60 = vld [vmem:[#allocation4 + $0x90] sm:$0xff] }
 0x428   :  { %2152 = vpow2.f32 %v1571_v56 }
 0x429   :  { %2154 = vpow2.f32 %v1572_v57  ;;  %v831_v57 = vld [vmem:[#allocation4 + $0x98] sm:$0xff] }
 0x42a   :  { %2156 = vpow2.f32 %v1573_v63 }
 0x42b   :  { %2158 = vtanh.f32 %v797_v2 }
 0x432   :  { %v2153_v3 = vpop.eup %2152 }
 0x433   :  { %v2155_v5 = vpop.eup %2154  ;;  %v802_v6 = vadd.f32 1.0, %v2153_v3 }
 0x434   :  { %v808_v11 = vadd.f32 1.0, %v2155_v5  ;;  %v2157_v12 = vpop.eup %2156 }
 0x435   :  { %2160 = vrcp.f32 %v802_v6  ;;  %v2159_v13 = vpop.eup %2158  ;;  %v815_v21 = vadd.f32 1.0, %v2157_v12 }
 0x436   :  { %2162 = vrcp.f32 %v808_v11 }
 0x437   :  { %2164 = vrcp.f32 %v815_v21 }
 0x43f   :  { %v2161_v16 = vpop.eup %2160 }
 0x440   :  { %v2163_v19 = vpop.eup %2162  ;;  %v819_v20 = vmul.f32 %v2161_v16, %v2159_v13 }
 0x441   :  { %v818_v23 = vmul.f32 %v2163_v19, %v2561_v29  ;;  %v2165_v36 = vpop.eup %2164  ;;  %v828_v29 = vld [vmem:[#allocation4 + $0x80] sm:$0xff] }
 0x443   :  { %v2599_v28 = vadd.f32 %v819_v20, %v818_v23 }
 0x445   :  { %2166 = vtanh.f32 %v2599_v28 }
 0x44f   :  { %v2167_v38 = vpop.eup %2166 }
 0x450   :  { %v822_v43 = vmul.f32 %v2167_v38, %v2165_v36 }
 0x452   :  { %897 = vmatmul.mubr.f32.vlgmr.msra.gmra.mrb[8].mxu0 %v822_v43  ;;  %968 = vmatmul.mubr.f32.vlgmr.msra.gmra.mrb[8].mxu1 %v822_v43 }
 0x453   :  { %1909 = vmatpush1.bf16.msra.mxu0 %v2353_v8  ;;  %1941 = vmatpush1.bf16.msra.mxu1 %v2366_v25 }
 0x454   :  { %1911 = vmatprep.subr.bf16.mxu0 %v2355_v9  ;;  %1943 = vmatprep.subr.bf16.mxu1 %v2376_v33 }
 0x455   :  { %1075 = vmatprep.mubr.f32.mxu0 %v2308_v0  ;;  %1146 = vmatprep.mubr.f32.mxu1 %v2308_v0 }
 0x457   :  { %1913 = vmatpush1.bf16.msra.mxu0 %v2359_v14  ;;  %1945 = vmatpush1.bf16.msra.mxu1 %v2378_v37 }
 0x458   :  { %1915 = vmatprep.subr.bf16.mxu0 %v2362_v17  ;;  %1947 = vmatprep.subr.bf16.mxu1 %v2384_v45 }
 0x45b   :  { %1917 = vmatpush1.bf16.msra.mxu0 %v2369_v26  ;;  %1949 = vmatpush1.bf16.msra.mxu1 %v2390_v48 }
 0x45c   :  { %1919 = vmatprep.subr.bf16.mxu0 %v2373_v30  ;;  %1951 = vmatprep.subr.bf16.mxu1 %v2393_v52 }
 0x45f   :  { %1921 = vmatpush1.bf16.msra.mxu0 %v2382_v42  ;;  %1953 = vmatpush1.bf16.msra.mxu1 %v2402_v62 }
 0x460   :  { %1923 = vmatprep.subr.bf16.mxu0 %v2387_v46  ;;  %1955 = vmatprep.subr.bf16.mxu1 %v2405_v1 }
 0x463   :  { %1925 = vmatpush1.bf16.msra.mxu0 %v2396_v55  ;;  %1957 = vmatpush1.bf16.msra.mxu1 %v2414_v15 }
 0x464   :  { %1927 = vmatprep.subr.bf16.mxu0 %v2399_v58  ;;  %1959 = vmatprep.subr.bf16.mxu1 %v2417_v18 }
 0x467   :  { %1929 = vmatpush1.bf16.msra.mxu0 %v2408_v7  ;;  %1961 = vmatpush1.bf16.msra.mxu1 %v2426_v31 }
 0x468   :  { %1931 = vmatprep.subr.bf16.mxu0 %v2411_v10  ;;  %1963 = vmatprep.subr.bf16.mxu1 %v2429_v32 }
 0x46b   :  { %1933 = vmatpush1.bf16.msra.mxu0 %v2420_v24  ;;  %1965 = vmatpush1.bf16.msra.mxu1 %v2436_v40 }
 0x46c   :  { %1935 = vmatprep.subr.bf16.mxu0 %v2423_v27  ;;  %1967 = vmatprep.subr.bf16.mxu1 %v2439_v41 }
 0x46f   :  { %1937 = vmatpush1.bf16.msra.mxu0 %v2432_v39  ;;  %1969 = vmatpush1.bf16.msra.mxu1 %v2443_v47 }
 0x470   :  { %1971 = vmatprep.subr.bf16.mxu0 %v2351_v4  ;;  %2003 = vmatprep.subr.bf16.mxu1 %v2364_v22 }
 0x525   :  { %v898_v35 = vpop.f32.mrb[8].mxu0  ;;  %v969_v44 = vpop.f32.mrb[8].mxu1 }
 0x526   :  { %v974_v49 = vadd.f32 %v898_v35, %v828_v29  ;;  %v900_v50 = vpop.f32.mrb[9].mxu0  ;;  %v971_v51 = vpop.f32.mrb[9].mxu1  ;;  %v976_v63 = vadd.f32 %v969_v44, %v830_v60  ;;  %v1008_v29 = vld [vmem:[#allocation4 + $0xa8] sm:$0xff] }
 0x527   :  { %v975_v53 = vadd.f32 %v900_v50, %v829_v34  ;;  %v977_v59 = vadd.f32 %v971_v51, %v831_v57 }
 0x528   :  { %v1574_v54 = vmul.f32 -1.442695, %v974_v49 }
 0x529   :  { %v1575_v56 = vmul.f32 -1.442695, %v975_v53  ;;  %v1576_v61 = vmul.f32 -1.442695, %v977_v59  ;;  %v1009_v59 = vld [vmem:[#allocation4 + $0xb0] sm:$0xff] }
 0x52a   :  { %2168 = vpow2.f32 %v1574_v54 }
 0x52b   :  { %2170 = vpow2.f32 %v1575_v56  ;;  %v1010_v56 = vld [vmem:[#allocation4 + $0xb8] sm:$0xff] }
 0x52c   :  { %2172 = vpow2.f32 %v1576_v61 }
 0x52d   :  { %2174 = vtanh.f32 %v976_v63 }
 0x534   :  { %v2169_v2 = vpop.eup %2168 }
 0x535   :  { %v2171_v3 = vpop.eup %2170  ;;  %v981_v5 = vadd.f32 1.0, %v2169_v2 }
 0x536   :  { %v987_v6 = vadd.f32 1.0, %v2171_v3  ;;  %v2173_v11 = vpop.eup %2172 }
 0x537   :  { %2176 = vrcp.f32 %v981_v5  ;;  %v2175_v12 = vpop.eup %2174  ;;  %v994_v20 = vadd.f32 1.0, %v2173_v11 }
 0x538   :  { %2178 = vrcp.f32 %v987_v6 }
 0x539   :  { %2180 = vrcp.f32 %v994_v20 }
 0x541   :  { %v2177_v13 = vpop.eup %2176 }
 0x542   :  { %v2179_v16 = vpop.eup %2178  ;;  %v998_v19 = vmul.f32 %v2177_v13, %v2175_v12 }
 0x543   :  { %v997_v21 = vmul.f32 %v2179_v16, %v2599_v28  ;;  %v2181_v36 = vpop.eup %2180  ;;  %v1007_v28 = vld [vmem:[#allocation4 + $0xa0] sm:$0xff] }
 0x545   :  { %v2637_v23 = vadd.f32 %v998_v19, %v997_v21 }
 0x547   :  { %2182 = vtanh.f32 %v2637_v23 }
 0x551   :  { %v2183_v38 = vpop.eup %2182 }
 0x552   :  { %v1001_v43 = vmul.f32 %v2183_v38, %v2181_v36 }
 0x554   :  { %1076 = vmatmul.mubr.f32.vlgmr.msra.gmra.mrb[10].mxu0 %v1001_v43  ;;  %1147 = vmatmul.mubr.f32.vlgmr.msra.gmra.mrb[10].mxu1 %v1001_v43 }
 0x555   :  { %1973 = vmatpush1.bf16.msra.mxu0 %v2353_v8  ;;  %2005 = vmatpush1.bf16.msra.mxu1 %v2366_v25 }
 0x556   :  { %1975 = vmatprep.subr.bf16.mxu0 %v2355_v9  ;;  %2007 = vmatprep.subr.bf16.mxu1 %v2376_v33 }
 0x557   :  { %1254 = vmatprep.mubr.f32.mxu0 %v2308_v0  ;;  %1325 = vmatprep.mubr.f32.mxu1 %v2308_v0 }
 0x559   :  { %1977 = vmatpush1.bf16.msra.mxu0 %v2359_v14  ;;  %2009 = vmatpush1.bf16.msra.mxu1 %v2378_v37 }
 0x55a   :  { %1979 = vmatprep.subr.bf16.mxu0 %v2362_v17  ;;  %2011 = vmatprep.subr.bf16.mxu1 %v2384_v45 }
 0x55d   :  { %1981 = vmatpush1.bf16.msra.mxu0 %v2369_v26  ;;  %2013 = vmatpush1.bf16.msra.mxu1 %v2390_v48 }
 0x55e   :  { %1983 = vmatprep.subr.bf16.mxu0 %v2373_v30  ;;  %2015 = vmatprep.subr.bf16.mxu1 %v2393_v52 }
 0x561   :  { %1985 = vmatpush1.bf16.msra.mxu0 %v2382_v42  ;;  %2017 = vmatpush1.bf16.msra.mxu1 %v2402_v62 }
 0x562   :  { %1987 = vmatprep.subr.bf16.mxu0 %v2387_v46  ;;  %2019 = vmatprep.subr.bf16.mxu1 %v2405_v1 }
 0x565   :  { %1989 = vmatpush1.bf16.msra.mxu0 %v2396_v55  ;;  %2021 = vmatpush1.bf16.msra.mxu1 %v2414_v15 }
 0x566   :  { %1991 = vmatprep.subr.bf16.mxu0 %v2399_v58  ;;  %2023 = vmatprep.subr.bf16.mxu1 %v2417_v18 }
 0x569   :  { %1993 = vmatpush1.bf16.msra.mxu0 %v2408_v7  ;;  %2025 = vmatpush1.bf16.msra.mxu1 %v2426_v31 }
 0x56a   :  { %1995 = vmatprep.subr.bf16.mxu0 %v2411_v10  ;;  %2027 = vmatprep.subr.bf16.mxu1 %v2429_v32 }
 0x56d   :  { %1997 = vmatpush1.bf16.msra.mxu0 %v2420_v24  ;;  %2029 = vmatpush1.bf16.msra.mxu1 %v2436_v40 }
 0x56e   :  { %1999 = vmatprep.subr.bf16.mxu0 %v2423_v27  ;;  %2031 = vmatprep.subr.bf16.mxu1 %v2439_v41 }
 0x571   :  { %2001 = vmatpush1.bf16.msra.mxu0 %v2432_v39  ;;  %2033 = vmatpush1.bf16.msra.mxu1 %v2443_v47 }
 0x572   :  { %2035 = vmatprep.subr.bf16.mxu0 %v2351_v4  ;;  %2067 = vmatprep.subr.bf16.mxu1 %v2364_v22 }
 0x627   :  { %v1077_v34 = vpop.f32.mrb[10].mxu0  ;;  %v1148_v35 = vpop.f32.mrb[10].mxu1 }
 0x628   :  { %v1153_v44 = vadd.f32 %v1077_v34, %v1007_v28  ;;  %v1079_v49 = vpop.f32.mrb[11].mxu0  ;;  %v1150_v50 = vpop.f32.mrb[11].mxu1  ;;  %v1155_v61 = vadd.f32 %v1148_v35, %v1009_v59 }
 0x629   :  { %v1154_v51 = vadd.f32 %v1079_v49, %v1008_v29  ;;  %v1156_v57 = vadd.f32 %v1150_v50, %v1010_v56  ;;  %v1368_v50 = vld [vmem:[#allocation4 + $0xf8] sm:$0xff] }
 0x62a   :  { %v1577_v53 = vmul.f32 -1.442695, %v1153_v44 }
 0x62b   :  { %v1578_v54 = vmul.f32 -1.442695, %v1154_v51  ;;  %v1579_v60 = vmul.f32 -1.442695, %v1156_v57 }
 0x62c   :  { %2184 = vpow2.f32 %v1577_v53  ;;  %v1367_v53 = vld [vmem:[#allocation4 + $0xf0] sm:$0xff] }
 0x62d   :  { %2186 = vpow2.f32 %v1578_v54 }
 0x62e   :  { %2188 = vpow2.f32 %v1579_v60 }
 0x62f   :  { %2190 = vtanh.f32 %v1155_v61 }
 0x636   :  { %v2185_v4 = vpop.eup %2184 }
 0x637   :  { %v2187_v63 = vpop.eup %2186  ;;  %v1160_v22 = vadd.f32 1.0, %v2185_v4 }
 0x638   :  { %v1166_v2 = vadd.f32 1.0, %v2187_v63  ;;  %v2189_v3 = vpop.eup %2188 }
 0x639   :  { %2192 = vrcp.f32 %v1160_v22  ;;  %v2191_v5 = vpop.eup %2190  ;;  %v1173_v13 = vadd.f32 1.0, %v2189_v3 }
 0x63a   :  { %2194 = vrcp.f32 %v1166_v2 }
 0x63b   :  { %2196 = vrcp.f32 %v1173_v13 }
 0x643   :  { %v2193_v6 = vpop.eup %2192 }
 0x644   :  { %v2195_v11 = vpop.eup %2194  ;;  %v1177_v12 = vmul.f32 %v2193_v6, %v2191_v5 }
 0x645   :  { %v1176_v16 = vmul.f32 %v2195_v11, %v2637_v23  ;;  %v2197_v20 = vpop.eup %2196  ;;  %v1366_v23 = vld [vmem:[#allocation4 + $0xe8] sm:$0xff] }
 0x647   :  { %v2675_v19 = vadd.f32 %v1177_v12, %v1176_v16 }
 0x649   :  { %2198 = vtanh.f32 %v2675_v19 }
 0x653   :  { %v2199_v21 = vpop.eup %2198 }
 0x654   :  { %v1180_v36 = vmul.f32 %v2199_v21, %v2197_v20 }
 0x656   :  { %1255 = vmatmul.mubr.f32.vlgmr.msra.gmra.mrb[12].mxu0 %v1180_v36  ;;  %1326 = vmatmul.mubr.f32.vlgmr.msra.gmra.mrb[12].mxu1 %v1180_v36 }
 0x657   :  { %2037 = vmatpush1.bf16.msra.mxu0 %v2353_v8  ;;  %2069 = vmatpush1.bf16.msra.mxu1 %v2366_v25  ;;  %v1187_v8 = vld [vmem:[#allocation4 + $0xc8] sm:$0xff] }
 0x658   :  { %2039 = vmatprep.subr.bf16.mxu0 %v2355_v9  ;;  %2071 = vmatprep.subr.bf16.mxu1 %v2376_v33 }
 0x659   :  { %1433 = vmatprep.mubr.f32.mxu0 %v2308_v0  ;;  %1504 = vmatprep.mubr.f32.mxu1 %v2308_v0  ;;  %v1186_v0 = vld [vmem:[#allocation4 + $0xc0] sm:$0xff] }
 0x65b   :  { %2041 = vmatpush1.bf16.msra.mxu0 %v2359_v14  ;;  %2073 = vmatpush1.bf16.msra.mxu1 %v2378_v37 }
 0x65c   :  { %2043 = vmatprep.subr.bf16.mxu0 %v2362_v17  ;;  %2075 = vmatprep.subr.bf16.mxu1 %v2384_v45 }
 0x65f   :  { %2045 = vmatpush1.bf16.msra.mxu0 %v2369_v26  ;;  %2077 = vmatpush1.bf16.msra.mxu1 %v2390_v48 }
 0x660   :  { %2047 = vmatprep.subr.bf16.mxu0 %v2373_v30  ;;  %2079 = vmatprep.subr.bf16.mxu1 %v2393_v52 }
 0x663   :  { %2049 = vmatpush1.bf16.msra.mxu0 %v2382_v42  ;;  %2081 = vmatpush1.bf16.msra.mxu1 %v2402_v62  ;;  %v1189_v42 = vld [vmem:[#allocation4 + $0xd8] sm:$0xff] }
 0x664   :  { %2051 = vmatprep.subr.bf16.mxu0 %v2387_v46  ;;  %2083 = vmatprep.subr.bf16.mxu1 %v2405_v1  ;;  %v1188_v46 = vld [vmem:[#allocation4 + $0xd0] sm:$0xff] }
 0x667   :  { %2053 = vmatpush1.bf16.msra.mxu0 %v2396_v55  ;;  %2085 = vmatpush1.bf16.msra.mxu1 %v2414_v15 }
 0x668   :  { %2055 = vmatprep.subr.bf16.mxu0 %v2399_v58  ;;  %2087 = vmatprep.subr.bf16.mxu1 %v2417_v18 }
 0x66b   :  { %2057 = vmatpush1.bf16.msra.mxu0 %v2408_v7  ;;  %2089 = vmatpush1.bf16.msra.mxu1 %v2426_v31 }
 0x66c   :  { %2059 = vmatprep.subr.bf16.mxu0 %v2411_v10  ;;  %2091 = vmatprep.subr.bf16.mxu1 %v2429_v32 }
 0x66f   :  { %2061 = vmatpush1.bf16.msra.mxu0 %v2420_v24  ;;  %2093 = vmatpush1.bf16.msra.mxu1 %v2436_v40 }
 0x670   :  { %2063 = vmatprep.subr.bf16.mxu0 %v2423_v27  ;;  %2095 = vmatprep.subr.bf16.mxu1 %v2439_v41 }
 0x673   :  { %2065 = vmatpush1.bf16.msra.mxu0 %v2432_v39  ;;  %2097 = vmatpush1.bf16.msra.mxu1 %v2443_v47  ;;  %v1365_v47 = vld [vmem:[#allocation4 + $0xe0] sm:$0xff] }
 0x729   :  { %v1256_v9 = vpop.f32.mrb[12].mxu0  ;;  %v1327_v14 = vpop.f32.mrb[12].mxu1 }
 0x72a   :  { %v1332_v17 = vadd.f32 %v1256_v9, %v1186_v0  ;;  %v1258_v25 = vpop.f32.mrb[13].mxu0  ;;  %v1329_v26 = vpop.f32.mrb[13].mxu1  ;;  %v1334_v52 = vadd.f32 %v1327_v14, %v1188_v46 }
 0x72b   :  { %v1333_v30 = vadd.f32 %v1258_v25, %v1187_v8  ;;  %v1335_v45 = vadd.f32 %v1329_v26, %v1189_v42 }
 0x72c   :  { %v1580_v33 = vmul.f32 -1.442695, %v1332_v17 }
 0x72d   :  { %v1581_v37 = vmul.f32 -1.442695, %v1333_v30  ;;  %v1582_v48 = vmul.f32 -1.442695, %v1335_v45 }
 0x72e   :  { %2200 = vpow2.f32 %v1580_v33 }
 0x72f   :  { %2202 = vpow2.f32 %v1581_v37 }
 0x730   :  { %2204 = vpow2.f32 %v1582_v48 }
 0x731   :  { %2206 = vtanh.f32 %v1334_v52 }
 0x738   :  { %v2201_v55 = vpop.eup %2200 }
 0x739   :  { %v2203_v58 = vpop.eup %2202  ;;  %v1339_v62 = vadd.f32 1.0, %v2201_v55 }
 0x73a   :  { %v1345_v1 = vadd.f32 1.0, %v2203_v58  ;;  %v2205_v7 = vpop.eup %2204 }
 0x73b   :  { %2208 = vrcp.f32 %v1339_v62  ;;  %v2207_v10 = vpop.eup %2206  ;;  %v1352_v27 = vadd.f32 1.0, %v2205_v7 }
 0x73c   :  { %2210 = vrcp.f32 %v1345_v1 }
 0x73d   :  { %2212 = vrcp.f32 %v1352_v27 }
 0x745   :  { %v2209_v15 = vpop.eup %2208 }
 0x746   :  { %v2211_v18 = vpop.eup %2210  ;;  %v1356_v24 = vmul.f32 %v2209_v15, %v2207_v10 }
 0x747   :  { %v1355_v31 = vmul.f32 %v2211_v18, %v2675_v19  ;;  %v2213_v39 = vpop.eup %2212 }
 0x749   :  { %v1357_v32 = vadd.f32 %v1356_v24, %v1355_v31 }
 0x74b   :  { %2214 = vtanh.f32 %v1357_v32 }
 0x755   :  { %v2215_v40 = vpop.eup %2214 }
 0x756   :  { %v1359_v41 = vmul.f32 %v2215_v40, %v2213_v39 }
 0x758   :  { %1434 = vmatmul.mubr.f32.vlgmr.msra.gmra.mrb[14].mxu0 %v1359_v41  ;;  %1505 = vmatmul.mubr.f32.vlgmr.msra.gmra.mrb[14].mxu1 %v1359_v41 }
 0x82b   :  { %v1435_v38 = vpop.f32.mrb[14].mxu0  ;;  %v1506_v43 = vpop.f32.mrb[14].mxu1 }
 0x82c   :  { %v1511_v28 = vadd.f32 %v1435_v38, %v1365_v47  ;;  %v1437_v29 = vpop.f32.mrb[15].mxu0  ;;  %v1508_v34 = vpop.f32.mrb[15].mxu1  ;;  %v1513_v56 = vadd.f32 %v1506_v43, %v1367_v53 }
 0x82d   :  { %v1512_v35 = vadd.f32 %v1437_v29, %v1366_v23  ;;  %v1514_v51 = vadd.f32 %v1508_v34, %v1368_v50 }
 0x82e   :  { %v1583_v44 = vmul.f32 -1.442695, %v1511_v28 }
 0x82f   :  { %v1584_v49 = vmul.f32 -1.442695, %v1512_v35  ;;  %v1585_v54 = vmul.f32 -1.442695, %v1514_v51 }
 0x830   :  { %2216 = vpow2.f32 %v1583_v44 }
 0x831   :  { %2218 = vpow2.f32 %v1584_v49 }
 0x832   :  { %2220 = vpow2.f32 %v1585_v54 }
 0x833   :  { %2222 = vtanh.f32 %v1513_v56 }
 0x83a   :  { %v2217_v57 = vpop.eup %2216 }
 0x83b   :  { %v2219_v59 = vpop.eup %2218  ;;  %v1518_v60 = vadd.f32 1.0, %v2217_v57 }
 0x83c   :  { %v1524_v61 = vadd.f32 1.0, %v2219_v59  ;;  %v2221_v4 = vpop.eup %2220 }
 0x83d   :  { %2224 = vrcp.f32 %v1518_v60  ;;  %v2223_v63 = vpop.eup %2222  ;;  %v1531_v5 = vadd.f32 1.0, %v2221_v4 }
 0x83e   :  { %2226 = vrcp.f32 %v1524_v61 }
 0x83f   :  { %2228 = vrcp.f32 %v1531_v5 }
 0x847   :  { %v2225_v22 = vpop.eup %2224 }
 0x848   :  { %v2227_v2 = vpop.eup %2226  ;;  %v1535_v3 = vmul.f32 %v2225_v22, %v2223_v63 }
 0x849   :  { %v1534_v6 = vmul.f32 %v2227_v2, %v1357_v32  ;;  %v2229_v12 = vpop.eup %2228 }
 0x84b   :  { %v1536_v11 = vadd.f32 %v1535_v3, %v1534_v6 }
 0x84d   :  { %2230 = vtanh.f32 %v1536_v11 }
 0x857   :  { %v2231_v13 = vpop.eup %2230 }
 0x858   :  { %v1538_v16 = vmul.f32 %v2231_v13, %v2229_v12 }
 0x85a   :  { %1545 = vst [vmem:[#allocation9] sm:$0xff] %v1538_v16 }
 0x85b   :  { %2287 = shalt.err (!%p2284_p6)
}
 0x85c   :  { %s2288_s10 = scalar_lea.hbm %s2725_s2, 128 }
 0x85d   :  { %p2289_p7 = scmp.ne.s32.totalorder %s2725_s2, %s2288_s10  ;;  %p2292_p8 = scmp.lt.u32.totalorder %s2288_s10, %s2725_s2 }
 0x85f   :  { %p2294_p9 = pnand %p2292_p8, %p2289_p7 }
 0x861   :  { %2297 = shalt.err (!%p2294_p9)
}
 0x862   :  { %1555 = dma.vmem_to_hbm [thread:$0]  %s1553_s6, 128, %s2725_s2, [#allocation6]  }
 0x863   :  { %2302 = dma.done.wait [#allocation6], 128  }
 0x864   :  { %2303 = vsyncadd [#allocation6], 4294967168 }
 0x865   :  { %1559 = vsyncpa [#allocation5], 1 }
 0x866   :  { %1560 = vsyncpa [#allocation8], 1 }
 0x867   :  { %1561 = vsyncpa [#allocation6], 1 }

</bundles_post_ra>
